<compile_context>
chip_gen: v6e
topology: v6e:2x2x1
jax: 0.10.0
libtpu: 0.0.40
codegen_flags: <defaults>
</compile_context>

<pallas_src>
import functools

import jax
import jax.numpy as jnp
from jax.experimental import pallas as pl
from jax.experimental.pallas import tpu as pltpu

# ----------------------------- config ---------------------------------------
H = 768          # BERT hidden size (fc = Linear(768*4, num_class))
L = 4            # last-4 hidden states are pooled + concatenated
NUM_CLASS = 32   # num_class (Cosine path hard-codes 32 classes)
C_PAD = 128      # class dim padded to a full lane width for unmasked stores
ALPHA = 0.7      # config.alpha
EPS = 1e-8       # cosine-similarity eps


# ------------------------- fused CCF kernel ----------------------------------
def ccf_fused_kernel(hs_ref, w_ref, b_ref, text_ref, title_ref, labn_ref,
                     label_ref,
                     logits_ref, scores_ref, stats_ref, *, num_class):
    # hs_ref: (L, B, S, H) bf16     w_ref: (L*H, C_PAD) bf16   b_ref: (1, C_PAD) f32
    # text_ref/title_ref: (B, H) bf16 CLS features
    # labn_ref: (C_PAD, H) bf16  -- pre-L2-normalized, zero-padded label rows
    # label_ref: (B, 1) int32
    l_dim, b_dim, s_dim, h_dim = hs_ref.shape
    c_pad = w_ref.shape[1]

    labels = label_ref[...]                                        # (B, 1) i32
    col = jax.lax.broadcasted_iota(jnp.int32, (b_dim, c_pad), 1)   # (B, C_PAD)
    valid = col < num_class                                        # pad mask
    onehot = (col == labels).astype(jnp.float32)                   # shared
    neg = jnp.float32(-1e30)

    # ---------------- Baseline: mean-pool last-4 layers -> fc -> CE ----------
    # f32 sum (not mean) over S per layer, concat along the lane axis to
    # (B, L*H), one K = L*H bf16 MXU dot with f32 accumulation, fold 1/S + bias
    # after the dot.
    pooled = jnp.concatenate(
        [jnp.sum(hs_ref[l].astype(jnp.float32), axis=1) for l in range(l_dim)],
        axis=-1)                                                   # (B, L*H)
    logits = (jnp.dot(pooled.astype(jnp.bfloat16), w_ref[...],
                      preferred_element_type=jnp.float32)
              * (1.0 / s_dim) + b_ref[...])                        # (B, C_PAD)
    logits_ref[...] = logits

    # cross-entropy (mean reduction) + argmax prediction + accuracy, all f32,
    # with padded columns masked out of the softmax / argmax.
    logits_m = jnp.where(valid, logits, neg)
    m = jnp.max(logits_m, axis=1, keepdims=True)                   # (B, 1)
    lse = m + jnp.log(jnp.sum(jnp.exp(logits_m - m), axis=1, keepdims=True))
    picked = jnp.sum(logits * onehot, axis=1, keepdims=True)
    ce_loss = jnp.mean(lse - picked, keepdims=True)                # (1, 1)
    ce_pred = jnp.min(jnp.where(logits_m == m, col, c_pad), axis=1,
                      keepdims=True)
    ce_pred = jnp.minimum(ce_pred, num_class - 1)                  # range guard
    ce_acc = jnp.mean((ce_pred == labels).astype(jnp.float32), keepdims=True)

    # ---------------- Cosine: blended cosine similarity -> MSE ---------------
    # Label features arrive pre-normalized; only the per-call queries need the
    # f32 norm / rsqrt.  The two cosine sims collapse into one MXU dot because
    # cosine similarity is linear in the normalized query.
    title = title_ref[...].astype(jnp.float32)                     # (B, H)
    text = text_ref[...].astype(jnp.float32)                       # (B, H)
    inv_title = jax.lax.rsqrt(
        jnp.maximum(jnp.sum(title * title, axis=1, keepdims=True), EPS * EPS))
    inv_text = jax.lax.rsqrt(
        jnp.maximum(jnp.sum(text * text, axis=1, keepdims=True), EPS * EPS))
    xmix = ALPHA * (title * inv_title) + (1.0 - ALPHA) * (text * inv_text)
    scores = jax.lax.dot_general(
        xmix.astype(jnp.bfloat16), labn_ref[...],
        (((1,), (1,)), ((), ())), preferred_element_type=jnp.float32)  # (B,C_PAD)
    scores_ref[...] = scores

    diff = jnp.where(valid, scores - onehot, 0.0)
    mse_loss = jnp.sum(diff * diff, keepdims=True) / (b_dim * num_class)
    scores_m = jnp.where(valid, scores, neg)
    sm = jnp.max(scores_m, axis=1, keepdims=True)
    mse_pred = jnp.min(jnp.where(scores_m == sm, col, c_pad), axis=1,
                       keepdims=True)
    mse_pred = jnp.minimum(mse_pred, num_class - 1)
    mse_acc = jnp.mean((mse_pred == labels).astype(jnp.float32), keepdims=True)

    # ---------------- pack all small results into ONE lane-dense block -------
    # stats[:, 0] = ce_pred, stats[:, 1] = mse_pred,
    # stats[:, 2] = ce_loss, stats[:, 3] = ce_acc,
    # stats[:, 4] = mse_loss, stats[:, 5] = mse_acc, rest = 0.
    stats = jnp.zeros((b_dim, c_pad), jnp.float32)
    stats = jnp.where(col == 0, ce_pred.astype(jnp.float32), stats)
    stats = jnp.where(col == 1, mse_pred.astype(jnp.float32), stats)
    stats = jnp.where(col == 2, ce_loss, stats)
    stats = jnp.where(col == 3, ce_acc, stats)
    stats = jnp.where(col == 4, mse_loss, stats)
    stats = jnp.where(col == 5, mse_acc, stats)
    stats_ref[...] = stats


# -------------------- one-time parameter preparation -------------------------
def prepare_params(fc_w, fc_b, label_feat, num_class=NUM_CLASS, c_pad=C_PAD):
    """Model-build-time prep (NOT per call): bf16 cast, class-dim padding,
    and L2-normalization of the (constant) label features."""
    k_in, h_dim = fc_w.shape[0], label_feat.shape[1]
    w_pad = jnp.zeros((k_in, c_pad), jnp.bfloat16)
    w_pad = w_pad.at[:, :num_class].set(fc_w.astype(jnp.bfloat16))
    b_pad = jnp.zeros((1, c_pad), jnp.float32)
    b_pad = b_pad.at[:, :num_class].set(fc_b.reshape(1, -1).astype(jnp.float32))
    labn = label_feat * jax.lax.rsqrt(
        jnp.maximum(jnp.sum(label_feat * label_feat, axis=1, keepdims=True),
                    EPS * EPS))
    labn_pad = jnp.zeros((c_pad, h_dim), jnp.bfloat16)
    labn_pad = labn_pad.at[:num_class].set(labn.astype(jnp.bfloat16))
    return w_pad, b_pad, labn_pad


# ------------------------------ forward --------------------------------------
@jax.jit
def ccf_fused_forward(hidden_states, w_pad, b_pad, text_cls, title_cls,
                      labn_pad, label):
    """Runs both the Baseline and Cosine paths in one pallas_call.

    Returns ((ce_loss, ce_acc, ce_pred, label), (mse_loss, mse_acc, mse_pred,
    label), logits, scores); the two tuples match the PyTorch forward outputs
    of each `method`.
    """
    l_dim, b_dim, s_dim, h_dim = hidden_states.shape
    c_pad = w_pad.shape[1]
    vmem = pl.BlockSpec(memory_space=pltpu.MemorySpace.VMEM)

    out_shape = (
        jax.ShapeDtypeStruct((b_dim, c_pad), jnp.float32),   # baseline logits
        jax.ShapeDtypeStruct((b_dim, c_pad), jnp.float32),   # cosine scores
        jax.ShapeDtypeStruct((b_dim, c_pad), jnp.float32),   # packed stats
    )
    inputs = (hidden_states, w_pad, b_pad, text_cls, title_cls, labn_pad, label)
    bytes_in = sum(int(a.size) * a.dtype.itemsize for a in inputs)
    bytes_out = 3 * b_dim * c_pad * 4
    cost = pl.CostEstimate(
        flops=int(2 * b_dim * (l_dim * h_dim) * c_pad        # fc dot
                  + 2 * b_dim * h_dim * c_pad                # cosine dot
                  + l_dim * b_dim * s_dim * h_dim            # seq pooling
                  + 8 * b_dim * h_dim + 16 * b_dim * c_pad), # norms / losses
        transcendentals=int(b_dim * c_pad + 4 * b_dim),      # exp/log/rsqrt
        bytes_accessed=int(bytes_in + bytes_out))

    logits_pad, scores_pad, stats = pl.pallas_call(
        functools.partial(ccf_fused_kernel, num_class=NUM_CLASS),
        in_specs=[vmem] * 7,
        out_specs=(vmem, vmem, vmem),
        out_shape=out_shape,
        cost_estimate=cost,
    )(*inputs)

    ce_pred = stats[:, 0].astype(jnp.int32)
    mse_pred = stats[:, 1].astype(jnp.int32)
    baseline = (stats[0, 2], stats[0, 3], ce_pred, label[:, 0])
    cosine = (stats[0, 4], stats[0, 5], mse_pred, label[:, 0])
    return baseline, cosine, logits_pad[:, :NUM_CLASS], scores_pad[:, :NUM_CLASS]


# ----------------------------- references (plain JAX) ------------------------
# Same bf16-operand / f32-accumulation matmul policy as the kernel (the only
# intentional approximation); everything else f32 and follows the PyTorch
# formulation (mean-pool+cat+fc+CE; cos-sim blend + MSE).
def baseline_ref(hs, fc_w, fc_b, label):
    pooled = jnp.mean(hs.astype(jnp.float32), axis=2)          # (L, B, H)
    x = jnp.transpose(pooled, (1, 0, 2)).reshape(hs.shape[1], -1)
    logits = jnp.dot(x.astype(jnp.bfloat16), fc_w.astype(jnp.bfloat16),
                     preferred_element_type=jnp.float32) + fc_b[0]
    lab = label[:, 0]
    logp = jax.nn.log_softmax(logits, axis=1)
    loss = -jnp.mean(logp[jnp.arange(lab.shape[0]), lab])
    pred = jnp.argmax(logits, axis=1)
    acc = jnp.mean((pred == lab).astype(jnp.float32))
    return loss, acc, pred, logits


def cosine_ref(text, title, labf, label, alpha=ALPHA):
    def normed(v):
        v = v.astype(jnp.float32)
        return v * jax.lax.rsqrt(
            jnp.maximum(jnp.sum(v * v, axis=1, keepdims=True), EPS * EPS))

    labn = normed(labf)
    xmix = alpha * normed(title) + (1.0 - alpha) * normed(text)
    out = jnp.dot(xmix.astype(jnp.bfloat16), labn.astype(jnp.bfloat16).T,
                  preferred_element_type=jnp.float32)          # (B, C)
    lab = label[:, 0]
    onehot = jax.nn.one_hot(lab, labf.shape[0], dtype=jnp.float32)
    loss = jnp.mean((out - onehot) ** 2)
    pred = jnp.argmax(out, axis=1)
    acc = jnp.mean((pred == lab).astype(jnp.float32))
    return loss, acc, pred, out


# --------------------------------- main --------------------------------------
if __name__ == "__main__":
    key = jax.random.PRNGKey(0)
    B, S, C = 2, 8, NUM_CLASS
    k1, k2, k3, k4, k5, k6, k7 = jax.random.split(key, 7)

    # synthetic BERT outputs (stand-ins for the pretrained encoder); the
    # producer emits activations in bf16, pooling accumulates in f32 in-kernel.
    hidden_states = jax.random.normal(k1, (L, B, S, H), jnp.float32).astype(
        jnp.bfloat16)
    text_cls = jax.random.normal(k2, (B, H), jnp.float32).astype(jnp.bfloat16)
    title_cls = jax.random.normal(k3, (B, H), jnp.float32).astype(jnp.bfloat16)
    label_feat = jax.random.normal(k4, (C, H), jnp.float32)
    label = jax.random.randint(k5, (B, 1), 0, C, jnp.int32)

    # deterministic fc parameters: Linear(768*4, num_class), stored transposed
    fc_w = jax.random.normal(k6, (L * H, C), jnp.float32) * 0.02
    fc_b = jax.random.normal(k7, (1, C), jnp.float32) * 0.02

    # one-time parameter prep (bf16 cast, lane-dense padding, label L2-norm)
    w_pad, b_pad, labn_pad = prepare_params(fc_w, fc_b, label_feat)

    baseline_out, cosine_out, logits, scores = ccf_fused_forward(
        hidden_states, w_pad, b_pad, text_cls, title_cls, labn_pad, label)
    jax.block_until_ready((baseline_out, cosine_out, logits, scores))

    # --- Baseline path check ---
    loss_b, acc_b, pred_b, lab_b = baseline_out
    rl, ra, rp, rlog = baseline_ref(hidden_states, fc_w, fc_b, label)
    assert jnp.allclose(logits, rlog, atol=1e-2, rtol=1e-2)
    assert jnp.allclose(loss_b, rl, atol=1e-4, rtol=1e-4)
    assert jnp.allclose(acc_b, ra, atol=1e-6)
    assert jnp.array_equal(pred_b, rp)
    assert jnp.array_equal(lab_b, label[:, 0])

    # --- Cosine path check ---
    loss_c, acc_c, pred_c, lab_c = cosine_out
    cl, ca, cp, csc = cosine_ref(text_cls, title_cls, label_feat, label)
    assert jnp.allclose(scores, csc, atol=1e-2, rtol=1e-2)
    assert jnp.allclose(loss_c, cl, atol=1e-4, rtol=1e-3)
    assert jnp.allclose(acc_c, ca, atol=1e-6)
    assert jnp.array_equal(pred_c, cp)
    assert jnp.array_equal(lab_c, label[:, 0])

    print("KERNEL_OK")
</pallas_src>

<mosaic_0001>
module attributes {stable_mosaic.version = 11 : i64} {
  func.func @ccf_fused_kernel(%arg0: memref<4x2x8x768xbf16, #tpu.memory_space<vmem>>, %arg1: memref<3072x128xbf16, #tpu.memory_space<vmem>>, %arg2: memref<1x128xf32, #tpu.memory_space<vmem>>, %arg3: memref<2x768xbf16, #tpu.memory_space<vmem>>, %arg4: memref<2x768xbf16, #tpu.memory_space<vmem>>, %arg5: memref<128x768xbf16, #tpu.memory_space<vmem>>, %arg6: memref<2x1xi32, #tpu.memory_space<vmem>>, %arg7: memref<2x128xf32, #tpu.memory_space<vmem>>, %arg8: memref<2x128xf32, #tpu.memory_space<vmem>>, %arg9: memref<2x128xf32, #tpu.memory_space<vmem>>) attributes {dimension_semantics = [], scalar_prefetch = 0 : i64, scratch_operands = 0 : i64, tpu.core_type = #tpu.core_type<tc>} {
    %c0 = arith.constant 0 : index
    %c0_0 = arith.constant 0 : index
    %0 = vector.load %arg6[%c0, %c0_0] : memref<2x1xi32, #tpu.memory_space<vmem>>, vector<2x1xi32>
    %1 = tpu.iota {dimensions = array<i32: 1>} : vector<2x128xi32>
    %c32_i32 = arith.constant 32 : i32
    %2 = vector.broadcast %c32_i32 : i32 to vector<2x128xi32>
    %3 = arith.cmpi slt, %1, %2 : vector<2x128xi32>
    %4 = vector.broadcast %0 : vector<2x1xi32> to vector<2x128xi32>
    %5 = arith.cmpi eq, %1, %4 : vector<2x128xi32>
    %6 = arith.extui %5 : vector<2x128xi1> to vector<2x128xi32>
    %7 = arith.sitofp %6 : vector<2x128xi32> to vector<2x128xf32>
    %c0_1 = arith.constant 0 : index
    %c0_2 = arith.constant 0 : index
    %c0_3 = arith.constant 0 : index
    %c0_4 = arith.constant 0 : index
    %8 = vector.load %arg0[%c0_1, %c0_2, %c0_3, %c0_4] : memref<4x2x8x768xbf16, #tpu.memory_space<vmem>>, vector<1x2x8x768xbf16>
    %9 = vector.shape_cast %8 : vector<1x2x8x768xbf16> to vector<2x8x768xbf16>
    %10 = arith.extf %9 : vector<2x8x768xbf16> to vector<2x8x768xf32>
    %cst = arith.constant dense<0.000000e+00> : vector<2x768xf32>
    %11 = vector.multi_reduction <add>, %10, %cst [1] : vector<2x8x768xf32> to vector<2x768xf32>
    %c1 = arith.constant 1 : index
    %c0_5 = arith.constant 0 : index
    %c0_6 = arith.constant 0 : index
    %c0_7 = arith.constant 0 : index
    %12 = vector.load %arg0[%c1, %c0_5, %c0_6, %c0_7] : memref<4x2x8x768xbf16, #tpu.memory_space<vmem>>, vector<1x2x8x768xbf16>
    %13 = vector.shape_cast %12 : vector<1x2x8x768xbf16> to vector<2x8x768xbf16>
    %14 = arith.extf %13 : vector<2x8x768xbf16> to vector<2x8x768xf32>
    %cst_8 = arith.constant dense<0.000000e+00> : vector<2x768xf32>
    %15 = vector.multi_reduction <add>, %14, %cst_8 [1] : vector<2x8x768xf32> to vector<2x768xf32>
    %c2 = arith.constant 2 : index
    %c0_9 = arith.constant 0 : index
    %c0_10 = arith.constant 0 : index
    %c0_11 = arith.constant 0 : index
    %16 = vector.load %arg0[%c2, %c0_9, %c0_10, %c0_11] : memref<4x2x8x768xbf16, #tpu.memory_space<vmem>>, vector<1x2x8x768xbf16>
    %17 = vector.shape_cast %16 : vector<1x2x8x768xbf16> to vector<2x8x768xbf16>
    %18 = arith.extf %17 : vector<2x8x768xbf16> to vector<2x8x768xf32>
    %cst_12 = arith.constant dense<0.000000e+00> : vector<2x768xf32>
    %19 = vector.multi_reduction <add>, %18, %cst_12 [1] : vector<2x8x768xf32> to vector<2x768xf32>
    %c3 = arith.constant 3 : index
    %c0_13 = arith.constant 0 : index
    %c0_14 = arith.constant 0 : index
    %c0_15 = arith.constant 0 : index
    %20 = vector.load %arg0[%c3, %c0_13, %c0_14, %c0_15] : memref<4x2x8x768xbf16, #tpu.memory_space<vmem>>, vector<1x2x8x768xbf16>
    %21 = vector.shape_cast %20 : vector<1x2x8x768xbf16> to vector<2x8x768xbf16>
    %22 = arith.extf %21 : vector<2x8x768xbf16> to vector<2x8x768xf32>
    %cst_16 = arith.constant dense<0.000000e+00> : vector<2x768xf32>
    %23 = vector.multi_reduction <add>, %22, %cst_16 [1] : vector<2x8x768xf32> to vector<2x768xf32>
    %24 = tpu.concatenate %11, %15, %19, %23 in 1 : vector<2x768xf32>, vector<2x768xf32>, vector<2x768xf32>, vector<2x768xf32> -> vector<2x3072xf32>
    %25 = arith.truncf %24 : vector<2x3072xf32> to vector<2x3072xbf16>
    %c0_17 = arith.constant 0 : index
    %c0_18 = arith.constant 0 : index
    %26 = vector.load %arg1[%c0_17, %c0_18] : memref<3072x128xbf16, #tpu.memory_space<vmem>>, vector<3072x128xbf16>
    %cst_19 = arith.constant dense<0.000000e+00> : vector<2x128xf32>
    %27 = tpu.matmul %25, %26, %cst_19 {dimension_numbers = #tpu.dot_dimension_numbers<[1], [0], [0], [1], [0, 0, 1, 1], [], []>} : vector<2x3072xbf16>, vector<3072x128xbf16>, vector<2x128xf32> -> vector<2x128xf32>
    %cst_20 = arith.constant 1.250000e-01 : f32
    %28 = vector.broadcast %cst_20 : f32 to vector<2x128xf32>
    %29 = arith.mulf %27, %28 : vector<2x128xf32>
    %c0_21 = arith.constant 0 : index
    %c0_22 = arith.constant 0 : index
    %30 = vector.load %arg2[%c0_21, %c0_22] : memref<1x128xf32, #tpu.memory_space<vmem>>, vector<1x128xf32>
    %31 = vector.broadcast %30 : vector<1x128xf32> to vector<2x128xf32>
    %32 = arith.addf %29, %31 : vector<2x128xf32>
    %c0_23 = arith.constant 0 : index
    %c0_24 = arith.constant 0 : index
    %33 = vector.load %arg7[%c0_23, %c0_24] : memref<2x128xf32, #tpu.memory_space<vmem>>, vector<2x128xf32>
    tpu.vector_store %arg7[%c0_23, %c0_24], %32 {strides = array<i32>} : memref<2x128xf32, #tpu.memory_space<vmem>>, vector<2x128xf32>,
    %cst_25 = arith.constant -1.000000e+30 : f32
    %34 = vector.broadcast %cst_25 : f32 to vector<2x128xf32>
    %35 = arith.select %3, %32, %34 : vector<2x128xi1>, vector<2x128xf32>
    %cst_26 = arith.constant dense<0xFF800000> : vector<2xf32>
    %36 = vector.multi_reduction <maximumf>, %35, %cst_26 [1] : vector<2x128xf32> to vector<2xf32>
    %37 = vector.shape_cast %36 : vector<2xf32> to vector<2x1xf32>
    %38 = vector.broadcast %37 : vector<2x1xf32> to vector<2x128xf32>
    %39 = arith.subf %35, %38 : vector<2x128xf32>
    %40 = math.exp %39 : vector<2x128xf32>
    %cst_27 = arith.constant dense<0.000000e+00> : vector<2xf32>
    %41 = vector.multi_reduction <add>, %40, %cst_27 [1] : vector<2x128xf32> to vector<2xf32>
    %42 = vector.shape_cast %41 : vector<2xf32> to vector<2x1xf32>
    %43 = math.log %42 : vector<2x1xf32>
    %44 = arith.addf %37, %43 : vector<2x1xf32>
    %45 = arith.mulf %32, %7 : vector<2x128xf32>
    %cst_28 = arith.constant dense<0.000000e+00> : vector<2xf32>
    %46 = vector.multi_reduction <add>, %45, %cst_28 [1] : vector<2x128xf32> to vector<2xf32>
    %47 = vector.shape_cast %46 : vector<2xf32> to vector<2x1xf32>
    %48 = arith.subf %44, %47 : vector<2x1xf32>
    %49 = vector.shape_cast %48 : vector<2x1xf32> to vector<1x2x1xf32>
    %cst_29 = arith.constant dense<0.000000e+00> : vector<1xf32>
    %50 = vector.multi_reduction <add>, %49, %cst_29 [1, 2] : vector<1x2x1xf32> to vector<1xf32>
    %51 = vector.shape_cast %50 : vector<1xf32> to vector<1x1x1xf32>
    %52 = vector.extract %51[0, 0, 0] : f32 from vector<1x1x1xf32>
    %53 = vector.broadcast %52 : f32 to vector<1x1xf32>
    %cst_30 = arith.constant 2.000000e+00 : f32
    %54 = vector.broadcast %cst_30 : f32 to vector<1x1xf32>
    %55 = arith.divf %53, %54 : vector<1x1xf32>
    %56 = vector.broadcast %37 : vector<2x1xf32> to vector<2x128xf32>
    %57 = arith.cmpf oeq, %35, %56 : vector<2x128xf32>
    %c128_i32 = arith.constant 128 : i32
    %58 = vector.broadcast %c128_i32 : i32 to vector<2x128xi32>
    %59 = arith.select %57, %1, %58 : vector<2x128xi1>, vector<2x128xi32>
    %cst_31 = arith.constant dense<2147483647> : vector<2xi32>
    %60 = vector.multi_reduction <minsi>, %59, %cst_31 [1] : vector<2x128xi32> to vector<2xi32>
    %61 = vector.shape_cast %60 : vector<2xi32> to vector<2x1xi32>
    %c31_i32 = arith.constant 31 : i32
    %62 = vector.broadcast %c31_i32 : i32 to vector<2x1xi32>
    %63 = arith.minsi %61, %62 : vector<2x1xi32>
    %64 = arith.cmpi eq, %63, %0 : vector<2x1xi32>
    %65 = arith.extui %64 : vector<2x1xi1> to vector<2x1xi32>
    %66 = arith.sitofp %65 : vector<2x1xi32> to vector<2x1xf32>
    %67 = vector.shape_cast %66 : vector<2x1xf32> to vector<1x2x1xf32>
    %cst_32 = arith.constant dense<0.000000e+00> : vector<1xf32>
    %68 = vector.multi_reduction <add>, %67, %cst_32 [1, 2] : vector<1x2x1xf32> to vector<1xf32>
    %69 = vector.shape_cast %68 : vector<1xf32> to vector<1x1x1xf32>
    %70 = vector.extract %69[0, 0, 0] : f32 from vector<1x1x1xf32>
    %71 = vector.broadcast %70 : f32 to vector<1x1xf32>
    %cst_33 = arith.constant 2.000000e+00 : f32
    %72 = vector.broadcast %cst_33 : f32 to vector<1x1xf32>
    %73 = arith.divf %71, %72 : vector<1x1xf32>
    %c0_34 = arith.constant 0 : index
    %c0_35 = arith.constant 0 : index
    %74 = vector.load %arg4[%c0_34, %c0_35] : memref<2x768xbf16, #tpu.memory_space<vmem>>, vector<2x768xbf16>
    %75 = arith.extf %74 : vector<2x768xbf16> to vector<2x768xf32>
    %c0_36 = arith.constant 0 : index
    %c0_37 = arith.constant 0 : index
    %76 = vector.load %arg3[%c0_36, %c0_37] : memref<2x768xbf16, #tpu.memory_space<vmem>>, vector<2x768xbf16>
    %77 = arith.extf %76 : vector<2x768xbf16> to vector<2x768xf32>
    %78 = arith.mulf %75, %75 : vector<2x768xf32>
    %cst_38 = arith.constant dense<0.000000e+00> : vector<2xf32>
    %79 = vector.multi_reduction <add>, %78, %cst_38 [1] : vector<2x768xf32> to vector<2xf32>
    %80 = vector.shape_cast %79 : vector<2xf32> to vector<2x1xf32>
    %cst_39 = arith.constant 1.000000e-16 : f32
    %81 = vector.broadcast %cst_39 : f32 to vector<2x1xf32>
    %82 = arith.maximumf %80, %81 : vector<2x1xf32>
    %83 = math.rsqrt %82 : vector<2x1xf32>
    %84 = arith.mulf %77, %77 : vector<2x768xf32>
    %cst_40 = arith.constant dense<0.000000e+00> : vector<2xf32>
    %85 = vector.multi_reduction <add>, %84, %cst_40 [1] : vector<2x768xf32> to vector<2xf32>
    %86 = vector.shape_cast %85 : vector<2xf32> to vector<2x1xf32>
    %cst_41 = arith.constant 1.000000e-16 : f32
    %87 = vector.broadcast %cst_41 : f32 to vector<2x1xf32>
    %88 = arith.maximumf %86, %87 : vector<2x1xf32>
    %89 = math.rsqrt %88 : vector<2x1xf32>
    %90 = vector.broadcast %83 : vector<2x1xf32> to vector<2x768xf32>
    %91 = arith.mulf %75, %90 : vector<2x768xf32>
    %cst_42 = arith.constant 0.699999988 : f32
    %92 = vector.broadcast %cst_42 : f32 to vector<2x768xf32>
    %93 = arith.mulf %92, %91 : vector<2x768xf32>
    %94 = vector.broadcast %89 : vector<2x1xf32> to vector<2x768xf32>
    %95 = arith.mulf %77, %94 : vector<2x768xf32>
    %cst_43 = arith.constant 3.000000e-01 : f32
    %96 = vector.broadcast %cst_43 : f32 to vector<2x768xf32>
    %97 = arith.mulf %96, %95 : vector<2x768xf32>
    %98 = arith.addf %93, %97 : vector<2x768xf32>
    %99 = arith.truncf %98 : vector<2x768xf32> to vector<2x768xbf16>
    %c0_44 = arith.constant 0 : index
    %c0_45 = arith.constant 0 : index
    %100 = vector.load %arg5[%c0_44, %c0_45] : memref<128x768xbf16, #tpu.memory_space<vmem>>, vector<128x768xbf16>
    %cst_46 = arith.constant dense<0.000000e+00> : vector<2x128xf32>
    %101 = tpu.matmul %99, %100, %cst_46 {dimension_numbers = #tpu.dot_dimension_numbers<[1], [1], [0], [0], [0, 0, 1, 0], [], []>} : vector<2x768xbf16>, vector<128x768xbf16>, vector<2x128xf32> -> vector<2x128xf32>
    %c0_47 = arith.constant 0 : index
    %c0_48 = arith.constant 0 : index
    %102 = vector.load %arg8[%c0_47, %c0_48] : memref<2x128xf32, #tpu.memory_space<vmem>>, vector<2x128xf32>
    tpu.vector_store %arg8[%c0_47, %c0_48], %101 {strides = array<i32>} : memref<2x128xf32, #tpu.memory_space<vmem>>, vector<2x128xf32>,
    %103 = arith.subf %101, %7 : vector<2x128xf32>
    %cst_49 = arith.constant 0.000000e+00 : f32
    %104 = vector.broadcast %cst_49 : f32 to vector<2x128xf32>
    %105 = arith.select %3, %103, %104 : vector<2x128xi1>, vector<2x128xf32>
    %106 = arith.mulf %105, %105 : vector<2x128xf32>
    %107 = vector.shape_cast %106 : vector<2x128xf32> to vector<1x2x128xf32>
    %cst_50 = arith.constant dense<0.000000e+00> : vector<1xf32>
    %108 = vector.multi_reduction <add>, %107, %cst_50 [1, 2] : vector<1x2x128xf32> to vector<1xf32>
    %109 = vector.shape_cast %108 : vector<1xf32> to vector<1x1x1xf32>
    %110 = vector.extract %109[0, 0, 0] : f32 from vector<1x1x1xf32>
    %111 = vector.broadcast %110 : f32 to vector<1x1xf32>
    %cst_51 = arith.constant 6.400000e+01 : f32
    %112 = vector.broadcast %cst_51 : f32 to vector<1x1xf32>
    %113 = arith.divf %111, %112 : vector<1x1xf32>
    %cst_52 = arith.constant -1.000000e+30 : f32
    %114 = vector.broadcast %cst_52 : f32 to vector<2x128xf32>
    %115 = arith.select %3, %101, %114 : vector<2x128xi1>, vector<2x128xf32>
    %cst_53 = arith.constant dense<0xFF800000> : vector<2xf32>
    %116 = vector.multi_reduction <maximumf>, %115, %cst_53 [1] : vector<2x128xf32> to vector<2xf32>
    %117 = vector.shape_cast %116 : vector<2xf32> to vector<2x1xf32>
    %118 = vector.broadcast %117 : vector<2x1xf32> to vector<2x128xf32>
    %119 = arith.cmpf oeq, %115, %118 : vector<2x128xf32>
    %c128_i32_54 = arith.constant 128 : i32
    %120 = vector.broadcast %c128_i32_54 : i32 to vector<2x128xi32>
    %121 = arith.select %119, %1, %120 : vector<2x128xi1>, vector<2x128xi32>
    %cst_55 = arith.constant dense<2147483647> : vector<2xi32>
    %122 = vector.multi_reduction <minsi>, %121, %cst_55 [1] : vector<2x128xi32> to vector<2xi32>
    %123 = vector.shape_cast %122 : vector<2xi32> to vector<2x1xi32>
    %c31_i32_56 = arith.constant 31 : i32
    %124 = vector.broadcast %c31_i32_56 : i32 to vector<2x1xi32>
    %125 = arith.minsi %123, %124 : vector<2x1xi32>
    %126 = arith.cmpi eq, %125, %0 : vector<2x1xi32>
    %127 = arith.extui %126 : vector<2x1xi1> to vector<2x1xi32>
    %128 = arith.sitofp %127 : vector<2x1xi32> to vector<2x1xf32>
    %129 = vector.shape_cast %128 : vector<2x1xf32> to vector<1x2x1xf32>
    %cst_57 = arith.constant dense<0.000000e+00> : vector<1xf32>
    %130 = vector.multi_reduction <add>, %129, %cst_57 [1, 2] : vector<1x2x1xf32> to vector<1xf32>
    %131 = vector.shape_cast %130 : vector<1xf32> to vector<1x1x1xf32>
    %132 = vector.extract %131[0, 0, 0] : f32 from vector<1x1x1xf32>
    %133 = vector.broadcast %132 : f32 to vector<1x1xf32>
    %cst_58 = arith.constant 2.000000e+00 : f32
    %134 = vector.broadcast %cst_58 : f32 to vector<1x1xf32>
    %135 = arith.divf %133, %134 : vector<1x1xf32>
    %cst_59 = arith.constant 0.000000e+00 : f32
    %136 = vector.broadcast %cst_59 : f32 to vector<2x128xf32>
    %c0_i32 = arith.constant 0 : i32
    %137 = vector.broadcast %c0_i32 : i32 to vector<2x128xi32>
    %138 = arith.cmpi eq, %1, %137 : vector<2x128xi32>
    %139 = arith.sitofp %63 : vector<2x1xi32> to vector<2x1xf32>
    %140 = vector.shape_cast %139 : vector<2x1xf32> to vector<2x1xf32>
    %141 = vector.broadcast %140 : vector<2x1xf32> to vector<2x128xf32>
    %142 = arith.select %138, %141, %136 : vector<2x128xi1>, vector<2x128xf32>
    %c1_i32 = arith.constant 1 : i32
    %143 = vector.broadcast %c1_i32 : i32 to vector<2x128xi32>
    %144 = arith.cmpi eq, %1, %143 : vector<2x128xi32>
    %145 = arith.sitofp %125 : vector<2x1xi32> to vector<2x1xf32>
    %146 = vector.shape_cast %145 : vector<2x1xf32> to vector<2x1xf32>
    %147 = vector.broadcast %146 : vector<2x1xf32> to vector<2x128xf32>
    %148 = arith.select %144, %147, %142 : vector<2x128xi1>, vector<2x128xf32>
    %c2_i32 = arith.constant 2 : i32
    %149 = vector.broadcast %c2_i32 : i32 to vector<2x128xi32>
    %150 = arith.cmpi eq, %1, %149 : vector<2x128xi32>
    %151 = vector.shape_cast %55 : vector<1x1xf32> to vector<1x1xf32>
    %152 = vector.broadcast %151 : vector<1x1xf32> to vector<2x128xf32>
    %153 = arith.select %150, %152, %148 : vector<2x128xi1>, vector<2x128xf32>
    %c3_i32 = arith.constant 3 : i32
    %154 = vector.broadcast %c3_i32 : i32 to vector<2x128xi32>
    %155 = arith.cmpi eq, %1, %154 : vector<2x128xi32>
    %156 = vector.shape_cast %73 : vector<1x1xf32> to vector<1x1xf32>
    %157 = vector.broadcast %156 : vector<1x1xf32> to vector<2x128xf32>
    %158 = arith.select %155, %157, %153 : vector<2x128xi1>, vector<2x128xf32>
    %c4_i32 = arith.constant 4 : i32
    %159 = vector.broadcast %c4_i32 : i32 to vector<2x128xi32>
    %160 = arith.cmpi eq, %1, %159 : vector<2x128xi32>
    %161 = vector.shape_cast %113 : vector<1x1xf32> to vector<1x1xf32>
    %162 = vector.broadcast %161 : vector<1x1xf32> to vector<2x128xf32>
    %163 = arith.select %160, %162, %158 : vector<2x128xi1>, vector<2x128xf32>
    %c5_i32 = arith.constant 5 : i32
    %164 = vector.broadcast %c5_i32 : i32 to vector<2x128xi32>
    %165 = arith.cmpi eq, %1, %164 : vector<2x128xi32>
    %166 = vector.shape_cast %135 : vector<1x1xf32> to vector<1x1xf32>
    %167 = vector.broadcast %166 : vector<1x1xf32> to vector<2x128xf32>
    %168 = arith.select %165, %167, %163 : vector<2x128xi1>, vector<2x128xf32>
    %c0_60 = arith.constant 0 : index
    %c0_61 = arith.constant 0 : index
    %169 = vector.load %arg9[%c0_60, %c0_61] : memref<2x128xf32, #tpu.memory_space<vmem>>, vector<2x128xf32>
    tpu.vector_store %arg9[%c0_60, %c0_61], %168 {strides = array<i32>} : memref<2x128xf32, #tpu.memory_space<vmem>>, vector<2x128xf32>,
    return
  }
}

</mosaic_0001>

<bundles_post_ra>
// kernel: ccf_fused_forward.1
= control target key start
LH: loop header
LB: loop body
LE: loop exit
PB: predicated region body
PF: predicated region fallthrough
CT: control target
= control target key end

     0   :  { %15 = vsyncpa [#allocation3], 0  ;;  %s4554_s0 = inlined_call_operand.hbm [shape: bf16[4,2,8,768], index: 0, kind: input, shape index: {}]   ;;  %s4555_s1 = inlined_call_operand.hbm [shape: bf16[3072,128], index: 1, kind: input, shape index: {}]   ;;  %s4556_s2 = inlined_call_operand.vmem [shape: f32[1,128], index: 2, kind: input, shape index: {}]   ;;  %s4557_s3 = inlined_call_operand.hbm [shape: bf16[2,768], index: 3, kind: input, shape index: {}]   ;;  %s4558_s4 = inlined_call_operand.hbm [shape: bf16[2,768], index: 4, kind: input, shape index: {}]   ;;  %s4559_s5 = inlined_call_operand.hbm [shape: bf16[128,768], index: 5, kind: input, shape index: {}]   ;;  %s4560_s6 = inlined_call_operand.vmem [shape: s32[2,1], index: 6, kind: input, shape index: {}]   ;;  %s4561_s7 = inlined_call_operand.hbm [shape: f32[2,128], index: 7, kind: output, shape index: {0}]   ;;  %s4562_s8 = inlined_call_operand.hbm [shape: f32[2,128], index: 8, kind: output, shape index: {1}]   ;;  %s4563_s9 = inlined_call_operand.vmem [shape: f32[2,128], index: 9, kind: output, shape index: {2}]  }
   0x1   :  { %16 = vsyncpa [#allocation6], 0 }
   0x2   :  { %17 = vsyncpa [#allocation9], 0 }
   0x3   :  { %18 = vsyncpa [#allocation4], 0 }
   0x4   :  { %19 = vsyncpa [#allocation13], 0  ;;  %s4323_s30 = smov [#allocation5]  }
   0x5   :  { %s37_s10 = sshll.u32 %s4323_s30, 4  ;;  %s38_s10 = int_to_ptr.vmem [resolvable:$true] %s37_s10 }
   0x6   :  { %s4181_s11 = scalar_lea.vmem %s38_s10, 24576  ;;  %p4186_p1 = scmp.lt.s32.totalorder %s38_s10, %s38_s10 }
   0x7   :  { %p4182_p0 = scmp.ne.s32.totalorder %s38_s10, %s4181_s11  ;;  %p4187_p2 = scmp.lt.s32.totalorder %s4181_s11, %s4181_s11 }
   0x9   :  { %p4188_p3 = por %p4187_p2, %p4186_p1 }
   0xb   :  { %p4189_p4 = pnand %p4188_p3, %p4182_p0 }
   0xd   :  { %4192 = shalt.err (!%p4189_p4)
}
   0xe   :  { %s4324_s12 = smov 64   ;;  %s4325_s13 = smov 4  }
   0xf   :  { %43 = dma.hbm_to_vmem [thread:$0]  %s4555_s1, 24576, %s38_s10, [#allocation6], %s4324_s12, %s4324_s12, %s4325_s13  }
  0x10   :  { %s4326_s16 = smov [#allocation8]   ;;  %s4327_s18 = smov [#allocation2]  }
  0x11   :  { %s62_s17 = sshll.u32 %s4326_s16, 4  ;;  %s25_s19 = sshll.u32 %s4327_s18, 4  ;;  %s63_s17 = int_to_ptr.vmem [resolvable:$true] %s62_s17  ;;  %s26_s19 = int_to_ptr.vmem [resolvable:$true] %s25_s19 }
  0x12   :  { %s4201_s20 = scalar_lea.vmem %s63_s17, 96  ;;  %p4206_p6 = scmp.lt.s32.totalorder %s63_s17, %s63_s17 }
  0x13   :  { %p4202_p5 = scmp.ne.s32.totalorder %s63_s17, %s4201_s20  ;;  %p4207_p7 = scmp.lt.s32.totalorder %s4201_s20, %s4201_s20 }
  0x15   :  { %p4208_p8 = por %p4207_p7, %p4206_p6 }
  0x17   :  { %p4209_p9 = pnand %p4208_p8, %p4202_p5 }
  0x19   :  { %4212 = shalt.err (!%p4209_p9)
}
  0x1a   :  { %65 = dma.hbm_to_vmem [thread:$0]  %s4558_s4, 96, %s63_s17, [#allocation9]  }
  0x1b   :  { %s4221_s23 = scalar_lea.vmem %s26_s19, 3072  ;;  %p4226_p11 = scmp.lt.s32.totalorder %s26_s19, %s26_s19 }
  0x1c   :  { %p4222_p10 = scmp.ne.s32.totalorder %s26_s19, %s4221_s23  ;;  %p4227_p12 = scmp.lt.s32.totalorder %s4221_s23, %s4221_s23 }
  0x1e   :  { %p4228_p13 = por %p4227_p12, %p4226_p11 }
  0x20   :  { %p4229_p0 = pnand %p4228_p13, %p4222_p10 }
  0x22   :  { %4232 = shalt.err (!%p4229_p0)
}
  0x23   :  { %s4328_s1 = smov 384   ;;  %s4329_s24 = smov 24  }
  0x24   :  { %31 = dma.hbm_to_vmem [thread:$0]  %s4554_s0, 3072, %s26_s19, [#allocation3], %s4328_s1, %s4328_s1, %s4329_s24  }
  0x25   :  { %s4330_s27 = smov [#allocation7]   ;;  %s4331_s29 = smov [#allocation10]  }
  0x26   :  { %s52_s28 = sshll.u32 %s4330_s27, 4  ;;  %s71_s30 = sshll.u32 %s4331_s29, 4  ;;  %s53_s28 = int_to_ptr.vmem [resolvable:$true] %s52_s28  ;;  %s72_s30 = int_to_ptr.vmem [resolvable:$true] %s71_s30 }
  0x27   :  { %s4241_s4 = scalar_lea.vmem %s53_s28, 96  ;;  %p4246_p2 = scmp.lt.s32.totalorder %s53_s28, %s53_s28 }
  0x28   :  { %p4242_p1 = scmp.ne.s32.totalorder %s53_s28, %s4241_s4  ;;  %p4247_p3 = scmp.lt.s32.totalorder %s4241_s4, %s4241_s4 }
  0x2a   :  { %p4248_p4 = por %p4247_p3, %p4246_p2 }
  0x2c   :  { %p4249_p5 = pnand %p4248_p4, %p4242_p1 }
  0x2e   :  { %4252 = shalt.err (!%p4249_p5)
}
  0x2f   :  { %55 = dma.hbm_to_vmem [thread:$0]  %s4557_s3, 96, %s53_s28, [#allocation6]  }
  0x30   :  { %s4261_s12 = scalar_lea.vmem %s72_s30, 6144  ;;  %p4266_p7 = scmp.lt.s32.totalorder %s72_s30, %s72_s30 }
  0x31   :  { %p4262_p6 = scmp.ne.s32.totalorder %s72_s30, %s4261_s12  ;;  %p4267_p8 = scmp.lt.s32.totalorder %s4261_s12, %s4261_s12 }
  0x33   :  { %p4268_p9 = por %p4267_p8, %p4266_p7 }
  0x35   :  { %p4269_p10 = pnand %p4268_p9, %p4262_p6 }
  0x37   :  { %4272 = shalt.err (!%p4269_p10)
}
  0x38   :  { %77 = dma.hbm_to_vmem [thread:$0]  %s4559_s5, 6144, %s72_s30, [#allocation9], %s4328_s1, %s4328_s1, %s4329_s24  }
  0x39   :  { %4313 = dma.done.wait [#allocation3], 3072  }
  0x3a   :  { %4314 = vsyncadd [#allocation3], 4294964224 }
  0x3b   :  { %4315 = dma.done.wait [#allocation6], 24672  }
  0x3c   :  { %4316 = vsyncadd [#allocation6], 4294942624 }
  0x3d   :  { %4317 = dma.done.wait [#allocation9], 6240  }
  0x3e   :  { %4318 = vsyncadd [#allocation9], 4294961056  ;;  %v3901_v0 = vld [vmem:[#allocation5 + $0x78] sm:$0xff]   ;;  %v3905_v4 = vld [vmem:[#allocation5 + $0x70] sm:$0xff]   ;;  %vm481_vm0 = vcmask 1041409   ;;  %vm2617_vm1 = vcmask 1041408  }
  0x3f   :  { %v3902_v1 = vld [vmem:[#allocation5 + $0x178] sm:$0xff]   ;;  %3613 = vmatprep.subr.bf16.mxu1 %v3901_v0  ;;  %v3906_v5 = vld [vmem:[#allocation5 + $0x170] sm:$0xff]   ;;  %v3909_v8 = vld [vmem:[#allocation5 + $0x68] sm:$0xff]   ;;  %vm2635_vm11 = vcmask 1024   ;;  %s4337_s16 = smov [#allocation12]  }
  0x40   :  { %v3903_v2 = vld [vmem:[#allocation5 + $0x38] sm:$0xff]   ;;  %3657 = vmatprep.subr.bf16.mxu0 %v3902_v1  ;;  %v3907_v6 = vld [vmem:[#allocation5 + $0x30] sm:$0xff]   ;;  %v3910_v9 = vld [vmem:[#allocation5 + $0x168] sm:$0xff]   ;;  %s3350_s17 = sshll.u32 %s4337_s16, 4  ;;  %s3351_s17 = int_to_ptr.vmem [resolvable:$true] %s3350_s17 }
  0x41   :  { %v3904_v3 = vld [vmem:[#allocation5 + $0x138] sm:$0xff]   ;;  %3614 = vmatpush3.bf16.msra.mxu1 %v3903_v2  ;;  %v3908_v7 = vld [vmem:[#allocation5 + $0x130] sm:$0xff]   ;;  %v3911_v10 = vld [vmem:[#allocation5 + $0x28] sm:$0xff]  }
  0x42   :  { %3658 = vmatpush3.bf16.msra.mxu0 %v3904_v3  ;;  %3615 = vmatprep.subr.bf16.mxu1 %v3905_v4  ;;  %v3912_v11 = vld [vmem:[#allocation5 + $0x128] sm:$0xff]   ;;  %v3913_v12 = vld [vmem:[#allocation5 + $0x60] sm:$0xff]   ;;  %v3917_v16 = vld [vmem:[#allocation5 + $0x58] sm:$0xff]  }
  0x43   :  { %3659 = vmatprep.subr.bf16.mxu0 %v3906_v5  ;;  %v3914_v13 = vld [vmem:[#allocation5 + $0x160] sm:$0xff]   ;;  %v3918_v17 = vld [vmem:[#allocation5 + $0x158] sm:$0xff]   ;;  %v3921_v20 = vld [vmem:[#allocation5 + $0x50] sm:$0xff]  }
  0x44   :  { %v3915_v14 = vld [vmem:[#allocation5 + $0x20] sm:$0xff]   ;;  %v3919_v18 = vld [vmem:[#allocation5 + $0x18] sm:$0xff]   ;;  %v3922_v21 = vld [vmem:[#allocation5 + $0x150] sm:$0xff]  }
  0x45   :  { %3616 = vmatpush3.bf16.msra.mxu1 %v3907_v6  ;;  %v3916_v15 = vld [vmem:[#allocation5 + $0x120] sm:$0xff]   ;;  %v3920_v19 = vld [vmem:[#allocation5 + $0x118] sm:$0xff]   ;;  %v3923_v22 = vld [vmem:[#allocation5 + $0x10] sm:$0xff]  }
  0x46   :  { %3660 = vmatpush3.bf16.msra.mxu0 %v3908_v7  ;;  %3617 = vmatprep.subr.bf16.mxu1 %v3909_v8  ;;  %v3924_v23 = vld [vmem:[#allocation5 + $0x110] sm:$0xff]   ;;  %v3925_v24 = vld [vmem:[#allocation5 + $0x48] sm:$0xff]   ;;  %v3929_v28 = vld [vmem:[#allocation5 + $0x40] sm:$0xff]  }
  0x47   :  { %3661 = vmatprep.subr.bf16.mxu0 %v3910_v9  ;;  %v3926_v25 = vld [vmem:[#allocation5 + $0x148] sm:$0xff]   ;;  %v3930_v29 = vld [vmem:[#allocation5 + $0x140] sm:$0xff]   ;;  %v109_v33 = vld [vmem:[#allocation2 + $0x18] sm:$0xff] }
  0x48   :  { %v3927_v26 = vld [vmem:[#allocation5 + $0x8] sm:$0xff]   ;;  %v3931_v30 = vld [vmem:[#allocation5] sm:$0xff]   ;;  %v108_v34 = vld [vmem:[#allocation2 + $0x10] sm:$0xff]  ;;  %v118_v37 = vunpack.c.l.bf16 %v109_v33  ;;  %v119_v38 = vunpack.c.h.bf16 %v109_v33 }
  0x49   :  { %3618 = vmatpush3.bf16.msra.mxu1 %v3911_v10  ;;  %v3928_v27 = vld [vmem:[#allocation5 + $0x108] sm:$0xff]   ;;  %v3932_v31 = vld [vmem:[#allocation5 + $0x100] sm:$0xff]   ;;  %v116_v40 = vunpack.c.l.bf16 %v108_v34  ;;  %v117_v41 = vunpack.c.h.bf16 %v108_v34  ;;  %v3933_v44 = vld [vmem:[#allocation5 + $0xf8] sm:$0xff]  }
  0x4a   :  { %3662 = vmatpush3.bf16.msra.mxu0 %v3912_v11  ;;  %3619 = vmatprep.subr.bf16.mxu1 %v3913_v12  ;;  %v106_v32 = vld [vmem:[#allocation2] sm:$0xff]  ;;  %v111_v39 = vld [vmem:[#allocation2 + $0x28] sm:$0xff]  ;;  %v166_v46 = vrot.slane %v119_v38, 4  ;;  %v160_v48 = vrot.slane %v118_v37, 4  ;;  %v3934_v49 = vld [vmem:[#allocation5 + $0x278] sm:$0xff]  }
  0x4b   :  { %3663 = vmatprep.subr.bf16.mxu0 %v3914_v13  ;;  %v112_v35 = vunpack.c.l.bf16 %v106_v32  ;;  %v113_v36 = vunpack.c.h.bf16 %v106_v32  ;;  %v122_v42 = vunpack.c.l.bf16 %v111_v39  ;;  %v123_v43 = vunpack.c.h.bf16 %v111_v39  ;;  %v3935_v32 = vld [vmem:[#allocation5 + $0xb8] sm:$0xff]  }
  0x4c   :  { %v154_v50 = vrot.slane %v117_v41, 4  ;;  %v148_v52 = vrot.slane %v116_v40, 4  ;;  %v167_v55 = vadd.f32 %v166_v46, %v119_v38  ;;  %v161_v57 = vadd.f32 %v160_v48, %v118_v37  ;;  %v3936_v37 = vld [vmem:[#allocation5 + $0x238] sm:$0xff]   ;;  %v3940_v46 = vld [vmem:[#allocation5 + $0x230] sm:$0xff]  }
  0x4d   :  { %3620 = vmatpush3.bf16.msra.mxu1 %v3915_v14  ;;  %v130_v45 = vrot.slane %v113_v36, 4  ;;  %v124_v47 = vrot.slane %v112_v35, 4  ;;  %v190_v51 = vrot.slane %v123_v43, 4  ;;  %v184_v53 = vrot.slane %v122_v42, 4 }
  0x4e   :  { %3664 = vmatpush3.bf16.msra.mxu0 %v3916_v15  ;;  %3621 = vmatprep.subr.bf16.mxu1 %v3917_v16  ;;  %v155_v58 = vadd.f32 %v154_v50, %v117_v41  ;;  %v149_v60 = vadd.f32 %v148_v52, %v116_v40  ;;  %v168_v63 = vrot.slane %v167_v55, 2  ;;  %v162_v1 = vrot.slane %v161_v57, 2  ;;  %v3937_v40 = vld [vmem:[#allocation5 + $0xf0] sm:$0xff]   ;;  %v3942_v50 = vld [vmem:[#allocation5 + $0x268] sm:$0xff]  }
  0x4f   :  { %3665 = vmatprep.subr.bf16.mxu0 %v3918_v17  ;;  %v131_v54 = vadd.f32 %v130_v45, %v113_v36  ;;  %v125_v56 = vadd.f32 %v124_v47, %v112_v35  ;;  %v191_v59 = vadd.f32 %v190_v51, %v123_v43  ;;  %v185_v61 = vadd.f32 %v184_v53, %v122_v42  ;;  %v3939_v45 = vld [vmem:[#allocation5 + $0xb0] sm:$0xff]   ;;  %v3941_v47 = vld [vmem:[#allocation5 + $0xe8] sm:$0xff]  }
  0x50   :  { %v156_v2 = vrot.slane %v155_v58, 2  ;;  %v150_v4 = vrot.slane %v149_v60, 2  ;;  %v169_v7 = vadd.f32 %v168_v63, %v167_v55  ;;  %v163_v9 = vadd.f32 %v162_v1, %v161_v57  ;;  %v3943_v51 = vld [vmem:[#allocation5 + $0xa8] sm:$0xff]   ;;  %v2686_v63 = vld [vmem:[#allocation7] sm:$0x3f] }
  0x51   :  { %3622 = vmatpush3.bf16.msra.mxu1 %v3919_v18  ;;  %v132_v62 = vrot.slane %v131_v54, 2  ;;  %v126_v0 = vrot.slane %v125_v56, 2  ;;  %v192_v3 = vrot.slane %v191_v59, 2  ;;  %v186_v5 = vrot.slane %v185_v61, 2  ;;  %v3944_v52 = vld [vmem:[#allocation5 + $0x228] sm:$0xff]  }
  0x52   :  { %3666 = vmatpush3.bf16.msra.mxu0 %v3920_v19  ;;  %3623 = vmatprep.subr.bf16.mxu1 %v3921_v20  ;;  %v157_v10 = vadd.f32 %v156_v2, %v155_v58  ;;  %v151_v12 = vadd.f32 %v150_v4, %v149_v60  ;;  %v170_v15 = vrot.slane %v169_v7, 1  ;;  %v164_v17 = vrot.slane %v163_v9, 1  ;;  %v2683_v53 = vld [vmem:[#allocation8] sm:$0x3f] }
  0x53   :  { %3667 = vmatprep.subr.bf16.mxu0 %v3922_v21  ;;  %v133_v6 = vadd.f32 %v132_v62, %v131_v54  ;;  %v127_v8 = vadd.f32 %v126_v0, %v125_v56  ;;  %v193_v11 = vadd.f32 %v192_v3, %v191_v59  ;;  %v187_v13 = vadd.f32 %v186_v5, %v185_v61  ;;  %v3945_v54 = vld [vmem:[#allocation5 + $0xe0] sm:$0xff]   ;;  %v3949_v0 = vld [vmem:[#allocation5 + $0xd8] sm:$0xff]  }
  0x54   :  { %v158_v18 = vrot.slane %v157_v10, 1  ;;  %v152_v20 = vrot.slane %v151_v12, 1  ;;  %v97_v41 = vlaneseq  ;;  %v4332_v42 = vmov 1983009808   ;;  %v3946_v58 = vld [vmem:[#allocation5 + $0x260] sm:$0xff]   ;;  %v3950_v5 = vld [vmem:[#allocation5 + $0x258] sm:$0xff]  }
  0x55   :  { %3624 = vmatpush3.bf16.msra.mxu1 %v3923_v22  ;;  %v134_v14 = vrot.slane %v133_v6, 1  ;;  %v128_v16 = vrot.slane %v127_v8, 1  ;;  %v194_v19 = vrot.slane %v193_v11, 1  ;;  %v188_v21 = vrot.slane %v187_v13, 1  ;;  %v3947_v59 = vld [vmem:[#allocation5 + $0xa0] sm:$0xff]  }
  0x56   :  { %3668 = vmatpush3.bf16.msra.mxu0 %v3924_v23  ;;  %3625 = vmatprep.subr.bf16.mxu1 %v3925_v24  ;;  %v171_v23 = vadd.f32 %v170_v15, %v169_v7  ;;  %v2695_v43 = vunpack.c.l.s4 %v4332_v42  ;;  %v4410_v55 = vunpack.c.l.bf16 %v2683_v53  ;;  %v4412_v56 = vunpack.c.h.bf16 %v2683_v53  ;;  %v3948_v62 = vld [vmem:[#allocation5 + $0x220] sm:$0xff]   ;;  %v3951_v7 = vld [vmem:[#allocation5 + $0x98] sm:$0xff]  }
  0x57   :  { %3669 = vmatprep.subr.bf16.mxu0 %v3926_v25  ;;  %v135_v22 = vadd.f32 %v134_v14, %v133_v6  ;;  %v129_v24 = vadd.f32 %v128_v16, %v127_v8  ;;  %v165_v25 = vadd.f32 %v164_v17, %v163_v9  ;;  %v4423_v4 = vunpack.c.l.bf16 %v2686_v63 }
  0x58   :  { %v2696_v48 = vunpack.c.0.s8 %v2695_v43  ;;  %v2689_v60 = vmul.f32 %v4410_v55, %v4410_v55  ;;  %v2690_v61 = vmul.f32 %v4412_v56, %v4412_v56  ;;  %v4425_v6 = vunpack.c.h.bf16 %v2686_v63 }
  0x59   :  { %3626 = vmatpush3.bf16.msra.mxu1 %v3927_v26  ;;  %v159_v26 = vadd.f32 %v158_v18, %v157_v10  ;;  %v3953_v18 = vld [vmem:[#allocation5 + $0xd0] sm:$0xff]  }
  0x5a   :  { %3670 = vmatpush3.bf16.msra.mxu0 %v3928_v27  ;;  %3627 = vmatprep.subr.bf16.mxu1 %v3929_v28  ;;  %v195_v27 = vadd.f32 %v194_v19, %v193_v11  ;;  %v153_v28 = vadd.f32 %v152_v20, %v151_v12  ;;  %v2693_v1 = vcombine.high %v2689_v60, %v2689_v60  ;;  %v3952_v11 = vld [vmem:[#allocation5 + $0x218] sm:$0xff]   ;;  %v3954_v19 = vld [vmem:[#allocation5 + $0x250] sm:$0xff]  }
  0x5b   :  { %3671 = vmatprep.subr.bf16.mxu0 %v3930_v29  ;;  %v189_v29 = vadd.f32 %v188_v21, %v187_v13  ;;  %v2739_v12 = vmul.f32 %v4423_v4, %v4423_v4  ;;  %v2740_v13 = vmul.f32 %v4425_v6, %v4425_v6  ;;  %v3955_v21 = vld [vmem:[#allocation5 + $0x90] sm:$0xff]  }
  0x5c   :  { %v487_v34 = vsel %vm481_vm0, %v195_v27, %v159_v26  ;;  %v3956_v26 = vld [vmem:[#allocation5 + $0x210] sm:$0xff]   ;;  %v3957_v27 = vld [vmem:[#allocation5 + $0xc8] sm:$0xff]  }
  0x5d   :  { %3628 = vmatpush3.bf16.msra.mxu1 %v3931_v30  ;;  %v483_v30 = vsel %vm481_vm0, %v171_v23, %v135_v22  ;;  %v486_v36 = vsel %vm481_vm0, %v189_v29, %v153_v28  ;;  %v571_v38 = vpack.c.bf16 %v487_v34, %v487_v34  ;;  %v2743_v22 = vcombine.high %v2739_v12, %v2739_v12 }
  0x5e   :  { %3672 = vmatpush3.bf16.msra.mxu0 %v3932_v31  ;;  %3635 = vmatprep.subr.bf16.mxu1 %v3933_v44  ;;  %v482_v31 = vsel %vm481_vm0, %v165_v25, %v129_v24  ;;  %v567_v33 = vpack.c.bf16 %v483_v30, %v483_v30  ;;  %v570_v39 = vpack.c.bf16 %v486_v36, %v486_v36  ;;  %v3938_v44 = vld [vmem:[#allocation5 + $0x270] sm:$0xff]  }
  0x5f   :  { %3701 = vmatprep.subr.bf16.mxu0 %v3934_v49  ;;  %v566_v35 = vpack.c.bf16 %v482_v31, %v482_v31  ;;  %2238 = vmatprep.mubr.bf16.mxu0 %v571_v38  ;;  %v4408_v49 = vshrl.u32 %v97_v41, 7  ;;  %v110_v38 = vld [vmem:[#allocation2 + $0x20] sm:$0xff] }
  0x60   :  { %2158 = vmatprep.mubr.bf16.mxu1 %v567_v33 }
  0x61   :  { %2159 = vmatmul.mubr.bf16.vlgmr.msra.gmra.mxu1 %v566_v35  ;;  %2239 = vmatmul.mubr.bf16.vlgmr.msra.gmra.mxu0 %v570_v39  ;;  %v4415_v57 = vsub.s32 %v2696_v48, %v4408_v49 }
  0x62   :  { %3636 = vmatpush3.bf16.msra.mxu1 %v3935_v32  ;;  %3702 = vmatpush3.bf16.msra.mxu0 %v3936_v37  ;;  %v3958_v32 = vld [vmem:[#allocation5 + $0x248] sm:$0xff]  }
  0x63   :  { %3637 = vmatprep.subr.bf16.mxu1 %v3937_v40  ;;  %3703 = vmatprep.subr.bf16.mxu0 %v3938_v44  ;;  %v2700_v2 = vrot.slane %v2689_v60, %v4415_v57  ;;  %v2716_v3 = vrot.slane %v2690_v61, %v4415_v57  ;;  %v2707_v8 = vrot.slane %v2693_v1, %v4415_v57  ;;  %v107_v37 = vld [vmem:[#allocation2 + $0x8] sm:$0xff]  ;;  %v3961_v61 = vld [vmem:[#allocation5 + $0xc0] sm:$0xff]  }
  0x64   :  { %v2750_v23 = vrot.slane %v2739_v12, %v4415_v57  ;;  %v2766_v24 = vrot.slane %v2740_v13, %v4415_v57  ;;  %v2757_v29 = vrot.slane %v2743_v22, %v4415_v57  ;;  %v3959_v44 = vld [vmem:[#allocation5 + $0x88] sm:$0xff]   ;;  %v114_v48 = vunpack.c.l.bf16 %v107_v37  ;;  %v3964_v13 = vld [vmem:[#allocation5 + $0x200] sm:$0xff]   ;;  %v3965_v22 = vld [vmem:[#allocation5 + $0x1f8] sm:$0xff]  }
  0x65   :  { %v2708_v9 = vcombine.high %v2700_v2, %v2700_v2  ;;  %v2724_v10 = vsel %vm2617_vm1, %v2700_v2, 0.0  ;;  %v2709_v14 = vcombine.high %v2707_v8, %v2707_v8  ;;  %v2717_v15 = vcombine.high %v2716_v3, %v2716_v3  ;;  %v3962_v2 = vld [vmem:[#allocation5 + $0x240] sm:$0xff]  }
  0x66   :  { %3638 = vmatpush3.bf16.msra.mxu1 %v3939_v45  ;;  %3704 = vmatpush3.bf16.msra.mxu0 %v3940_v46  ;;  %v2727_v17 = vsel %vm2617_vm1, %v2707_v8, 0.0  ;;  %v2758_v30 = vcombine.high %v2750_v23, %v2750_v23  ;;  %v2767_v31 = vcombine.high %v2766_v24, %v2766_v24  ;;  %v2731_v33 = vsel %vm2617_vm1, %v2716_v3, 0.0  ;;  %v198_v45 = vld [vmem:[#allocation2 + $0x38] sm:$0xff] }
  0x67   :  { %3639 = vmatprep.subr.bf16.mxu1 %v3941_v47  ;;  %3705 = vmatprep.subr.bf16.mxu0 %v3942_v50  ;;  %v2725_v16 = vsel %vm2617_vm1, %v2708_v9, 0.0  ;;  %v2729_v25 = vsel %vm2617_vm1, %v2709_v14, 0.0  ;;  %v2733_v34 = vsel %vm2617_vm1, %v2717_v15, 0.0  ;;  %v2774_v35 = vsel %vm2617_vm1, %v2750_v23, 0.0  ;;  %v3963_v9 = vld [vmem:[#allocation5 + $0x80] sm:$0xff]  }
  0x68   :  { %v2726_v20 = vadd.f32 %v2725_v16, %v2724_v10  ;;  %v2781_v36 = vsel %vm2617_vm1, %v2766_v24, 0.0  ;;  %v2759_v40 = vcombine.high %v2757_v29, %v2757_v29  ;;  %v2775_v42 = vsel %vm2617_vm1, %v2758_v30, 0.0 }
  0x69   :  { %v2777_v43 = vsel %vm2617_vm1, %v2757_v29, 0.0  ;;  %v2776_v46 = vadd.f32 %v2775_v42, %v2774_v35  ;;  %v2783_v47 = vsel %vm2617_vm1, %v2767_v31, 0.0  ;;  %v115_v50 = vunpack.c.h.bf16 %v107_v37 }
  0x6a   :  { %3640 = vmatpush3.bf16.msra.mxu1 %v3943_v51  ;;  %3706 = vmatpush3.bf16.msra.mxu0 %v3944_v52  ;;  %v2728_v28 = vadd.f32 %v2727_v17, %v2726_v20  ;;  %v4446_v51 = vld [vmem:[#allocation2 + $0x50] sm:$0xff]  ;;  %v2779_v53 = vsel %vm2617_vm1, %v2759_v40, 0.0  ;;  %v205_v63 = vunpack.c.l.bf16 %v198_v45  ;;  %v136_v12 = vrot.slane %v114_v48, 4 }
  0x6b   :  { %3641 = vmatprep.subr.bf16.mxu1 %v3945_v54  ;;  %3707 = vmatprep.subr.bf16.mxu0 %v3946_v58  ;;  %v3960_v54 = vld [vmem:[#allocation5 + $0x208] sm:$0xff]   ;;  %v120_v58 = vunpack.c.l.bf16 %v110_v38  ;;  %v2778_v60 = vadd.f32 %v2777_v43, %v2776_v46 }
  0x6c   :  { %v2730_v39 = vadd.f32 %v2729_v25, %v2728_v28  ;;  %v227_v17 = vrot.slane %v205_v63, 4 }
  0x6d   :  { %v2780_v8 = vadd.f32 %v2779_v53, %v2778_v60  ;;  %v172_v16 = vrot.slane %v120_v58, 4 }
  0x6e   :  { %3642 = vmatpush3.bf16.msra.mxu1 %v3947_v59  ;;  %3708 = vmatpush3.bf16.msra.mxu0 %v3948_v62  ;;  %v2732_v52 = vadd.f32 %v2731_v33, %v2730_v39  ;;  %v121_v59 = vunpack.c.h.bf16 %v110_v38  ;;  %v142_v62 = vrot.slane %v115_v50, 4 }
  0x6f   :  { %3643 = vmatprep.subr.bf16.mxu1 %v3949_v0  ;;  %3709 = vmatprep.subr.bf16.mxu0 %v3950_v5  ;;  %v206_v0 = vunpack.c.h.bf16 %v198_v45  ;;  %v211_v5 = vunpack.c.l.bf16 %v4446_v51  ;;  %v173_v25 = vadd.f32 %v172_v16, %v120_v58 }
  0x70   :  { %v2734_v1 = vadd.f32 %v2733_v34, %v2732_v52  ;;  %v178_v3 = vrot.slane %v121_v59, 4  ;;  %v143_v10 = vadd.f32 %v142_v62, %v115_v50 }
  0x71   :  { %v174_v34 = vrot.slane %v173_v25, 2  ;;  %v263_v39 = vrot.slane %v211_v5, 4 }
  0x72   :  { %3644 = vmatpush3.bf16.msra.mxu1 %v3951_v7  ;;  %3710 = vmatpush3.bf16.msra.mxu0 %v3952_v11  ;;  %v212_v7 = vunpack.c.h.bf16 %v4446_v51  ;;  %v233_v11 = vrot.slane %v206_v0, 4  ;;  %v179_v14 = vadd.f32 %v178_v3, %v121_v59  ;;  %v3967_v3 = vld [vmem:[#allocation5 + $0x1b8] sm:$0xff]  }
  0x73   :  { %3645 = vmatprep.subr.bf16.mxu1 %v3953_v18  ;;  %3711 = vmatprep.subr.bf16.mxu0 %v3954_v19  ;;  %v2782_v18 = vadd.f32 %v2781_v36, %v2780_v8  ;;  %v144_v19 = vrot.slane %v143_v10, 2  ;;  %v175_v43 = vadd.f32 %v174_v34, %v173_v25  ;;  %v3978_v25 = vld [vmem:[#allocation5 + $0x360] sm:$0xff]   ;;  %v291_v34 = vld [vmem:[#allocation2 + $0x78] sm:$0xff] }
  0x74   :  { %2735 = vadd.xlane.f32.xlu0 %v2734_v1  ;;  %v269_v15 = vrot.slane %v212_v7, 4  ;;  %v234_v20 = vadd.f32 %v233_v11, %v206_v0  ;;  %v180_v23 = vrot.slane %v179_v14, 2 }
  0x75   :  { %v2784_v28 = vadd.f32 %v2783_v47, %v2782_v18  ;;  %v145_v29 = vadd.f32 %v144_v19, %v143_v10  ;;  %v176_v52 = vrot.slane %v175_v43, 1  ;;  %v3969_v10 = vld [vmem:[#allocation5 + $0x1f0] sm:$0xff]   ;;  %v3975_v19 = vld [vmem:[#allocation5 + $0x1a8] sm:$0xff]  }
  0x76   :  { %3646 = vmatpush3.bf16.msra.mxu1 %v3955_v21  ;;  %3712 = vmatpush3.bf16.msra.mxu0 %v3956_v26  ;;  %v137_v21 = vadd.f32 %v136_v12, %v114_v48  ;;  %v270_v24 = vadd.f32 %v269_v15, %v212_v7  ;;  %v228_v26 = vadd.f32 %v227_v17, %v205_v63  ;;  %v235_v30 = vrot.slane %v234_v20, 2  ;;  %v3968_v12 = vld [vmem:[#allocation5 + $0x338] sm:$0xff]   ;;  %v3973_v15 = vld [vmem:[#allocation5 + $0x1e8] sm:$0xff]   ;;  %v3970_v17 = vld [vmem:[#allocation5 + $0x370] sm:$0xff]  }
  0x77   :  { %3647 = vmatprep.subr.bf16.mxu1 %v3957_v27  ;;  %3713 = vmatprep.subr.bf16.mxu0 %v3958_v32  ;;  %v3966_v27 = vld [vmem:[#allocation5 + $0x378] sm:$0xff]   ;;  %v181_v32 = vadd.f32 %v180_v23, %v179_v14  ;;  %v146_v36 = vrot.slane %v145_v29, 1  ;;  %v264_v48 = vadd.f32 %v263_v39, %v211_v5  ;;  %v177_v62 = vadd.f32 %v176_v52, %v175_v43  ;;  %v3972_v18 = vld [vmem:[#allocation5 + $0x330] sm:$0xff]   ;;  %v3979_v23 = vld [vmem:[#allocation5 + $0x1a0] sm:$0xff]  }
  0x78   :  { %v138_v31 = vrot.slane %v137_v21, 2  ;;  %v271_v33 = vrot.slane %v270_v24, 2  ;;  %v229_v35 = vrot.slane %v228_v26, 2  ;;  %2785 = vadd.xlane.f32.xlu0 %v2784_v28  ;;  %v236_v37 = vadd.f32 %v235_v30, %v234_v20  ;;  %v3977_v20 = vld [vmem:[#allocation5 + $0x1e0] sm:$0xff]   ;;  %v3985_v28 = vld [vmem:[#allocation5 + $0x1d0] sm:$0xff]   ;;  %v200_v30 = vld [vmem:[#allocation2 + $0x48] sm:$0xff] }
  0x79   :  { %v182_v40 = vrot.slane %v181_v32, 1  ;;  %v147_v45 = vadd.f32 %v146_v36, %v145_v29  ;;  %v265_v59 = vrot.slane %v264_v48, 2  ;;  %v197_v29 = vld [vmem:[#allocation2 + $0x30] sm:$0xff]  ;;  %v209_v36 = vunpack.c.l.bf16 %v200_v30 }
  0x7a   :  { %3648 = vmatpush3.bf16.msra.mxu1 %v3959_v44  ;;  %3714 = vmatpush3.bf16.msra.mxu0 %v3960_v54  ;;  %v139_v38 = vadd.f32 %v138_v31, %v137_v21  ;;  %v272_v42 = vadd.f32 %v271_v33, %v270_v24  ;;  %v230_v44 = vadd.f32 %v229_v35, %v228_v26  ;;  %v237_v46 = vrot.slane %v236_v37, 1  ;;  %v3974_v21 = vld [vmem:[#allocation5 + $0x368] sm:$0xff]   ;;  %v3981_v24 = vld [vmem:[#allocation5 + $0x1d8] sm:$0xff]   ;;  %v3980_v26 = vld [vmem:[#allocation5 + $0x320] sm:$0xff]  }
  0x7b   :  { %3649 = vmatprep.subr.bf16.mxu1 %v3961_v61  ;;  %3715 = vmatprep.subr.bf16.mxu0 %v3962_v2  ;;  %v183_v50 = vadd.f32 %v182_v40, %v181_v32  ;;  %v266_v0 = vadd.f32 %v265_v59, %v264_v48  ;;  %v203_v31 = vunpack.c.l.bf16 %v197_v29  ;;  %v204_v32 = vunpack.c.h.bf16 %v197_v29  ;;  %v288_v33 = vld [vmem:[#allocation2 + $0x60] sm:$0xff]  ;;  %v3982_v35 = vld [vmem:[#allocation5 + $0x358] sm:$0xff]  }
  0x7c   :  { %v140_v47 = vrot.slane %v139_v38, 1  ;;  %v273_v51 = vrot.slane %v272_v42, 1  ;;  %v238_v53 = vadd.f32 %v237_v46, %v236_v37  ;;  %v231_v58 = vrot.slane %v230_v44, 1  ;;  %v3984_v40 = vld [vmem:[#allocation5 + $0x318] sm:$0xff]   ;;  %v3987_v46 = vld [vmem:[#allocation5 + $0x190] sm:$0xff]  }
  0x7d   :  { %v485_v60 = vsel %vm481_vm0, %v183_v50, %v147_v45  ;;  %v210_v37 = vunpack.c.h.bf16 %v200_v30  ;;  %v295_v39 = vunpack.c.h.bf16 %v288_v33  ;;  %v300_v43 = vunpack.c.l.bf16 %v291_v34 }
  0x7e   :  { %3650 = vmatpush3.bf16.msra.mxu1 %v3963_v9  ;;  %3716 = vmatpush3.bf16.msra.mxu0 %v3964_v13  ;;  %v141_v54 = vadd.f32 %v140_v47, %v139_v38  ;;  %v274_v61 = vadd.f32 %v273_v51, %v272_v42  ;;  %v569_v63 = vpack.c.bf16 %v485_v60, %v485_v60  ;;  %v267_v9 = vrot.slane %v266_v0, 1  ;;  %v3971_v13 = vld [vmem:[#allocation5 + $0x1b0] sm:$0xff]   ;;  %v3989_v47 = vld [vmem:[#allocation5 + $0x1c8] sm:$0xff]  }
  0x7f   :  { %3679 = vmatprep.subr.bf16.mxu1 %v3965_v22  ;;  %3745 = vmatprep.subr.bf16.mxu0 %v3966_v27  ;;  %v232_v8 = vadd.f32 %v231_v58, %v230_v44  ;;  %v3976_v22 = vld [vmem:[#allocation5 + $0x328] sm:$0xff]   ;;  %v3983_v27 = vld [vmem:[#allocation5 + $0x198] sm:$0xff]   ;;  %v294_v38 = vunpack.c.l.bf16 %v288_v33  ;;  %v221_v42 = vrot.slane %v204_v32, 4  ;;  %v301_v44 = vunpack.c.h.bf16 %v291_v34  ;;  %v3986_v60 = vld [vmem:[#allocation5 + $0x350] sm:$0xff]  }
  0x80   :  { %v509_v1 = vsel %vm481_vm0, %v274_v61, %v238_v53  ;;  %v484_v2 = vsel %vm481_vm0, %v177_v62, %v141_v54  ;;  %2198 = vmatprep.mubr.bf16.mxu1 %v569_v63  ;;  %v268_v11 = vadd.f32 %v267_v9, %v266_v0  ;;  %v215_v45 = vrot.slane %v203_v31, 4  ;;  %v3993_v9 = vld [vmem:[#allocation5 + $0x1c0] sm:$0xff]  }
  0x81   :  { %v575_v5 = vpack.c.bf16 %v509_v1, %v509_v1  ;;  %v568_v7 = vpack.c.bf16 %v484_v2, %v484_v2  ;;  %v257_v48 = vrot.slane %v210_v37, 4  ;;  %v312_v50 = vrot.slane %v295_v39, 4  ;;  %v3988_v1 = vld [vmem:[#allocation5 + $0x310] sm:$0xff]  }
  0x82   :  { %v508_v14 = vsel %vm481_vm0, %v268_v11, %v232_v8  ;;  %v251_v51 = vrot.slane %v209_v36, 4  ;;  %v306_v52 = vrot.slane %v294_v38, 4  ;;  %v222_v53 = vadd.f32 %v221_v42, %v204_v32  ;;  %v3991_v8 = vld [vmem:[#allocation5 + $0x188] sm:$0xff]   ;;  %v3997_v32 = vld [vmem:[#allocation5 + $0x2f8] sm:$0xff]  }
  0x83   :  { %2318 = vmatprep.mubr.bf16.mxu0 %v575_v5  ;;  %2199 = vmatmul.mubr.bf16.vlgmr.msra.gmra.mxu1 %v568_v7  ;;  %v574_v16 = vpack.c.bf16 %v508_v14, %v508_v14  ;;  %v348_v54 = vrot.slane %v301_v44, 4  ;;  %v216_v58 = vadd.f32 %v215_v45, %v203_v31  ;;  %v342_v59 = vrot.slane %v300_v43, 4 }
  0x84   :  { %3680 = vmatpush3.bf16.msra.mxu1 %v3967_v3  ;;  %v258_v61 = vadd.f32 %v257_v48, %v210_v37  ;;  %v313_v62 = vadd.f32 %v312_v50, %v295_v39  ;;  %v252_v63 = vadd.f32 %v251_v51, %v209_v36  ;;  %v307_v0 = vadd.f32 %v306_v52, %v294_v38  ;;  %v3994_v38 = vld [vmem:[#allocation5 + $0x340] sm:$0xff]   ;;  %v3998_v50 = vld [vmem:[#allocation5 + $0x478] sm:$0xff]  }
  0x85   :  { %3681 = vmatprep.subr.bf16.mxu1 %v3969_v10  ;;  %2319 = vmatmul.mubr.bf16.vlgmr.msra.gmra.mxu0 %v574_v16  ;;  %v223_v2 = vrot.slane %v222_v53, 2  ;;  %v349_v3 = vadd.f32 %v348_v54, %v301_v44  ;;  %v217_v5 = vrot.slane %v216_v58, 2  ;;  %v343_v7 = vadd.f32 %v342_v59, %v300_v43  ;;  %v3996_v44 = vld [vmem:[#allocation5 + $0x300] sm:$0xff]   ;;  %v3999_v54 = vld [vmem:[#allocation5 + $0x2b8] sm:$0xff]  }
  0x86   :  { %3746 = vmatpush3.bf16.msra.mxu0 %v3968_v12  ;;  %v259_v10 = vrot.slane %v258_v61, 2  ;;  %v314_v11 = vrot.slane %v313_v62, 2  ;;  %v253_v12 = vrot.slane %v252_v63, 2 }
  0x87   :  { %3747 = vmatprep.subr.bf16.mxu0 %v3970_v17  ;;  %v224_v14 = vadd.f32 %v223_v2, %v222_v53  ;;  %v218_v16 = vadd.f32 %v217_v5, %v216_v58  ;;  %v344_v17 = vrot.slane %v343_v7, 2  ;;  %v4004_v2 = vld [vmem:[#allocation5 + $0x430] sm:$0xff]   ;;  %v4007_v5 = vld [vmem:[#allocation5 + $0x2a8] sm:$0xff]  }
  0x88   :  { %3682 = vmatpush3.bf16.msra.mxu1 %v3971_v13  ;;  %v308_v13 = vrot.slane %v307_v0, 2 }
  0x89   :  { %3683 = vmatprep.subr.bf16.mxu1 %v3973_v15  ;;  %v350_v15 = vrot.slane %v349_v3, 2 }
  0x8a   :  { %3748 = vmatpush3.bf16.msra.mxu0 %v3972_v18  ;;  %v3990_v18 = vld [vmem:[#allocation5 + $0x348] sm:$0xff]  }
  0x8b   :  { %3749 = vmatprep.subr.bf16.mxu0 %v3974_v21  ;;  %v254_v21 = vadd.f32 %v253_v12, %v252_v63  ;;  %v4002_v63 = vld [vmem:[#allocation5 + $0x470] sm:$0xff]   ;;  %v4012_v12 = vld [vmem:[#allocation5 + $0x420] sm:$0xff]  }
  0x8c   :  { %3684 = vmatpush3.bf16.msra.mxu1 %v3975_v19  ;;  %v260_v19 = vadd.f32 %v259_v10, %v258_v61  ;;  %v4000_v61 = vld [vmem:[#allocation5 + $0x438] sm:$0xff]   ;;  %v4011_v10 = vld [vmem:[#allocation5 + $0x2a0] sm:$0xff]  }
  0x8d   :  { %3685 = vmatprep.subr.bf16.mxu1 %v3977_v20  ;;  %v315_v20 = vadd.f32 %v314_v11, %v313_v62  ;;  %v255_v31 = vrot.slane %v254_v21, 1  ;;  %v4013_v11 = vld [vmem:[#allocation5 + $0x2d8] sm:$0xff]  }
  0x8e   :  { %3750 = vmatpush3.bf16.msra.mxu0 %v3976_v22  ;;  %v309_v22 = vadd.f32 %v308_v13, %v307_v0  ;;  %v261_v29 = vrot.slane %v260_v19, 1  ;;  %v4003_v0 = vld [vmem:[#allocation5 + $0x2b0] sm:$0xff]   ;;  %v4014_v13 = vld [vmem:[#allocation5 + $0x458] sm:$0xff]  }
  0x8f   :  { %3751 = vmatprep.subr.bf16.mxu0 %v3978_v25  ;;  %v351_v25 = vadd.f32 %v350_v15, %v349_v3  ;;  %v316_v30 = vrot.slane %v315_v20, 1  ;;  %v256_v42 = vadd.f32 %v255_v31, %v254_v21  ;;  %v4006_v3 = vld [vmem:[#allocation5 + $0x468] sm:$0xff]   ;;  %v4017_v15 = vld [vmem:[#allocation5 + $0x2d0] sm:$0xff]   ;;  %v202_v21 = vld [vmem:[#allocation2 + $0x58] sm:$0xff] }
  0x90   :  { %3686 = vmatpush3.bf16.msra.mxu1 %v3979_v23  ;;  %v3992_v23 = vld [vmem:[#allocation5 + $0x308] sm:$0xff]   ;;  %v310_v33 = vrot.slane %v309_v22, 1  ;;  %v262_v39 = vadd.f32 %v261_v29, %v260_v19 }
  0x91   :  { %3687 = vmatprep.subr.bf16.mxu1 %v3981_v24  ;;  %v225_v24 = vrot.slane %v224_v14, 1  ;;  %v4021_v19 = vld [vmem:[#allocation5 + $0x2c8] sm:$0xff]  }
  0x92   :  { %3752 = vmatpush3.bf16.msra.mxu0 %v3980_v26  ;;  %v219_v26 = vrot.slane %v218_v16, 1  ;;  %v311_v43 = vadd.f32 %v310_v33, %v309_v22  ;;  %v290_v22 = vld [vmem:[#allocation2 + $0x70] sm:$0xff]  ;;  %v4022_v33 = vld [vmem:[#allocation5 + $0x448] sm:$0xff]  }
  0x93   :  { %3753 = vmatprep.subr.bf16.mxu0 %v3982_v35  ;;  %v226_v34 = vadd.f32 %v225_v24, %v224_v14  ;;  %v352_v35 = vrot.slane %v351_v25, 1  ;;  %v4015_v14 = vld [vmem:[#allocation5 + $0x298] sm:$0xff]   ;;  %v298_v29 = vunpack.c.l.bf16 %v290_v22 }
  0x94   :  { %3688 = vmatpush3.bf16.msra.mxu1 %v3983_v27  ;;  %v345_v27 = vadd.f32 %v344_v17, %v343_v7  ;;  %v220_v36 = vadd.f32 %v219_v26, %v218_v16  ;;  %v4009_v7 = vld [vmem:[#allocation5 + $0x2e0] sm:$0xff]   ;;  %v4016_v16 = vld [vmem:[#allocation5 + $0x418] sm:$0xff]   ;;  %v4019_v17 = vld [vmem:[#allocation5 + $0x290] sm:$0xff]   ;;  %v214_v26 = vunpack.c.h.bf16 %v202_v21 }
  0x95   :  { %3689 = vmatprep.subr.bf16.mxu1 %v3985_v28  ;;  %v3995_v28 = vld [vmem:[#allocation5 + $0x180] sm:$0xff]   ;;  %v353_v45 = vadd.f32 %v352_v35, %v351_v25  ;;  %v213_v25 = vunpack.c.l.bf16 %v202_v21 }
  0x96   :  { %3754 = vmatpush3.bf16.msra.mxu0 %v3984_v40  ;;  %v346_v37 = vrot.slane %v345_v27, 1  ;;  %v317_v40 = vadd.f32 %v316_v30, %v315_v20  ;;  %v506_v48 = vsel %vm481_vm0, %v256_v42, %v220_v36  ;;  %v199_v20 = vld [vmem:[#allocation2 + $0x40] sm:$0xff]  ;;  %v299_v30 = vunpack.c.h.bf16 %v290_v22 }
  0x97   :  { %3755 = vmatprep.subr.bf16.mxu0 %v3986_v60  ;;  %v572_v53 = vpack.c.bf16 %v506_v48, %v506_v48  ;;  %v4001_v60 = vld [vmem:[#allocation5 + $0x2f0] sm:$0xff]   ;;  %v208_v24 = vunpack.c.h.bf16 %v199_v20  ;;  %v4025_v35 = vld [vmem:[#allocation5 + $0x2c0] sm:$0xff]   ;;  %v4024_v48 = vld [vmem:[#allocation5 + $0x408] sm:$0xff]  }
  0x98   :  { %3690 = vmatpush3.bf16.msra.mxu1 %v3987_v46  ;;  %v347_v46 = vadd.f32 %v346_v37, %v345_v27  ;;  %v531_v52 = vsel %vm481_vm0, %v353_v45, %v317_v40  ;;  %v293_v27 = vld [vmem:[#allocation2 + $0x88] sm:$0xff]  ;;  %v281_v37 = vrot.slane %v214_v26, 4  ;;  %v336_v40 = vrot.slane %v299_v30, 4 }
  0x99   :  { %3691 = vmatprep.subr.bf16.mxu1 %v3989_v47  ;;  %v507_v47 = vsel %vm481_vm0, %v262_v39, %v226_v34  ;;  %v579_v58 = vpack.c.bf16 %v531_v52, %v531_v52  ;;  %v304_v31 = vunpack.c.l.bf16 %v293_v27  ;;  %v4023_v34 = vld [vmem:[#allocation5 + $0x288] sm:$0xff]   ;;  %v245_v36 = vrot.slane %v208_v24, 4 }
  0x9a   :  { %3756 = vmatpush3.bf16.msra.mxu0 %v3988_v1  ;;  %v573_v51 = vpack.c.bf16 %v507_v47, %v507_v47  ;;  %v530_v59 = vsel %vm481_vm0, %v347_v46, %v311_v43  ;;  %v4005_v1 = vld [vmem:[#allocation5 + $0x2e8] sm:$0xff]   ;;  %v275_v39 = vrot.slane %v213_v25, 4  ;;  %v330_v43 = vrot.slane %v298_v29, 4 }
  0x9b   :  { %3757 = vmatprep.subr.bf16.mxu0 %v3990_v18  ;;  %2398 = vmatprep.mubr.bf16.mxu0 %v579_v58  ;;  %v578_v62 = vpack.c.bf16 %v530_v59, %v530_v59  ;;  %v4018_v18 = vld [vmem:[#allocation5 + $0x450] sm:$0xff]   ;;  %v246_v45 = vadd.f32 %v245_v36, %v208_v24  ;;  %v282_v46 = vadd.f32 %v281_v37, %v214_v26  ;;  %v4027_v58 = vld [vmem:[#allocation5 + $0x280] sm:$0xff]  }
  0x9c   :  { %3692 = vmatpush3.bf16.msra.mxu1 %v3991_v8  ;;  %2278 = vmatprep.mubr.bf16.mxu1 %v573_v51  ;;  %v4008_v8 = vld [vmem:[#allocation5 + $0x428] sm:$0xff]   ;;  %v276_v52 = vadd.f32 %v275_v39, %v213_v25  ;;  %v4033_v39 = vld [vmem:[#allocation5 + $0x3f0] sm:$0xff]  }
  0x9d   :  { %3693 = vmatprep.subr.bf16.mxu1 %v3993_v9  ;;  %v4010_v9 = vld [vmem:[#allocation5 + $0x460] sm:$0xff]   ;;  %v247_v59 = vrot.slane %v246_v45, 2 }
  0x9e   :  { %3758 = vmatpush3.bf16.msra.mxu0 %v3992_v23  ;;  %v207_v23 = vunpack.c.l.bf16 %v199_v20 }
  0x9f   :  { %3759 = vmatprep.subr.bf16.mxu0 %v3994_v38 }
  0xa0   :  { %3694 = vmatpush3.bf16.msra.mxu1 %v3995_v28  ;;  %v4020_v28 = vld [vmem:[#allocation5 + $0x410] sm:$0xff]   ;;  %v239_v38 = vrot.slane %v207_v23, 4 }
  0xa1   :  { %3723 = vmatprep.subr.bf16.mxu1 %v3997_v32  ;;  %v305_v32 = vunpack.c.h.bf16 %v293_v27  ;;  %v4030_v27 = vld [vmem:[#allocation5 + $0x578] sm:$0xff]  }
  0xa2   :  { %3760 = vmatpush3.bf16.msra.mxu0 %v3996_v44  ;;  %v366_v44 = vrot.slane %v304_v31, 4  ;;  %v240_v47 = vadd.f32 %v239_v38, %v207_v23 }
  0xa3   :  { %2279 = vmatmul.mubr.bf16.vlgmr.msra.gmra.mxu1 %v572_v53  ;;  %3789 = vmatprep.subr.bf16.mxu0 %v3998_v50  ;;  %v372_v42 = vrot.slane %v305_v32, 4  ;;  %v337_v50 = vadd.f32 %v336_v40, %v299_v30  ;;  %v331_v53 = vadd.f32 %v330_v43, %v298_v29 }
  0xa4   :  { %3724 = vmatpush3.bf16.msra.mxu1 %v3999_v54  ;;  %v4026_v54 = vld [vmem:[#allocation5 + $0x440] sm:$0xff]  }
  0xa5   :  { %3725 = vmatprep.subr.bf16.mxu1 %v4001_v60  ;;  %2399 = vmatmul.mubr.bf16.vlgmr.msra.gmra.mxu0 %v578_v62  ;;  %v373_v51 = vadd.f32 %v372_v42, %v305_v32  ;;  %v283_v60 = vrot.slane %v282_v46, 2  ;;  %v367_v62 = vadd.f32 %v366_v44, %v304_v31  ;;  %v4031_v32 = vld [vmem:[#allocation5 + $0x3b8] sm:$0xff]   ;;  %v4034_v44 = vld [vmem:[#allocation5 + $0x570] sm:$0xff]  }
  0xa6   :  { %3790 = vmatpush3.bf16.msra.mxu0 %v4000_v61  ;;  %v241_v61 = vrot.slane %v240_v47, 2 }
  0xa7   :  { %3791 = vmatprep.subr.bf16.mxu0 %v4002_v63  ;;  %v338_v63 = vrot.slane %v337_v50, 2 }
  0xa8   :  { %3726 = vmatpush3.bf16.msra.mxu1 %v4003_v0  ;;  %v374_v0 = vrot.slane %v373_v51, 2 }
  0xa9   :  { %3727 = vmatprep.subr.bf16.mxu1 %v4005_v1  ;;  %v277_v1 = vrot.slane %v276_v52, 2 }
  0xaa   :  { %3792 = vmatpush3.bf16.msra.mxu0 %v4004_v2  ;;  %v332_v2 = vrot.slane %v331_v53, 2 }
  0xab   :  { %3793 = vmatprep.subr.bf16.mxu0 %v4006_v3  ;;  %v248_v3 = vadd.f32 %v247_v59, %v246_v45  ;;  %v4044_v59 = vld [vmem:[#allocation5 + $0x520] sm:$0xff]  }
  0xac   :  { %3728 = vmatpush3.bf16.msra.mxu1 %v4007_v5  ;;  %v284_v5 = vadd.f32 %v283_v60, %v282_v46  ;;  %v4035_v46 = vld [vmem:[#allocation5 + $0x3b0] sm:$0xff]   ;;  %v4045_v60 = vld [vmem:[#allocation5 + $0x3d8] sm:$0xff]  }
  0xad   :  { %3729 = vmatprep.subr.bf16.mxu1 %v4009_v7  ;;  %v242_v7 = vadd.f32 %v241_v61, %v240_v47  ;;  %v4036_v47 = vld [vmem:[#allocation5 + $0x530] sm:$0xff]   ;;  %v4046_v61 = vld [vmem:[#allocation5 + $0x558] sm:$0xff]  }
  0xae   :  { %3794 = vmatpush3.bf16.msra.mxu0 %v4008_v8  ;;  %v4029_v8 = vld [vmem:[#allocation5 + $0x3f8] sm:$0xff]  }
  0xaf   :  { %3795 = vmatprep.subr.bf16.mxu0 %v4010_v9  ;;  %v368_v9 = vrot.slane %v367_v62, 2 }
  0xb0   :  { %3730 = vmatpush3.bf16.msra.mxu1 %v4011_v10  ;;  %v339_v10 = vadd.f32 %v338_v63, %v337_v50  ;;  %v4038_v50 = vld [vmem:[#allocation5 + $0x568] sm:$0xff]   ;;  %v4048_v63 = vld [vmem:[#allocation5 + $0x518] sm:$0xff]  }
  0xb1   :  { %3731 = vmatprep.subr.bf16.mxu1 %v4013_v11  ;;  %v375_v11 = vadd.f32 %v374_v0, %v373_v51  ;;  %v4039_v51 = vld [vmem:[#allocation5 + $0x3a8] sm:$0xff]   ;;  %v4049_v0 = vld [vmem:[#allocation5 + $0x3d0] sm:$0xff]  }
  0xb2   :  { %3796 = vmatpush3.bf16.msra.mxu0 %v4012_v12  ;;  %v278_v12 = vadd.f32 %v277_v1, %v276_v52  ;;  %v4040_v52 = vld [vmem:[#allocation5 + $0x528] sm:$0xff]   ;;  %v4050_v1 = vld [vmem:[#allocation5 + $0x550] sm:$0xff]  }
  0xb3   :  { %3797 = vmatprep.subr.bf16.mxu0 %v4014_v13  ;;  %v333_v13 = vadd.f32 %v332_v2, %v331_v53  ;;  %v376_v20 = vrot.slane %v375_v11, 1  ;;  %v4041_v53 = vld [vmem:[#allocation5 + $0x3e0] sm:$0xff]   ;;  %v4051_v2 = vld [vmem:[#allocation5 + $0x390] sm:$0xff]  }
  0xb4   :  { %3732 = vmatpush3.bf16.msra.mxu1 %v4015_v14  ;;  %v4028_v14 = vld [vmem:[#allocation5 + $0x400] sm:$0xff]   ;;  %v279_v21 = vrot.slane %v278_v12, 1 }
  0xb5   :  { %3733 = vmatprep.subr.bf16.mxu1 %v4017_v15  ;;  %v249_v15 = vrot.slane %v248_v3, 1  ;;  %v334_v22 = vrot.slane %v333_v13, 1  ;;  %v377_v29 = vadd.f32 %v376_v20, %v375_v11  ;;  %v4055_v20 = vld [vmem:[#allocation5 + $0x388] sm:$0xff]  }
  0xb6   :  { %3798 = vmatpush3.bf16.msra.mxu0 %v4016_v16  ;;  %v285_v16 = vrot.slane %v284_v5, 1  ;;  %v280_v30 = vadd.f32 %v279_v21, %v278_v12 }
  0xb7   :  { %3799 = vmatprep.subr.bf16.mxu0 %v4018_v18  ;;  %v369_v18 = vadd.f32 %v368_v9, %v367_v62  ;;  %v250_v23 = vadd.f32 %v249_v15, %v248_v3  ;;  %v335_v31 = vadd.f32 %v334_v22, %v333_v13  ;;  %v4047_v62 = vld [vmem:[#allocation5 + $0x398] sm:$0xff]   ;;  %v4052_v3 = vld [vmem:[#allocation5 + $0x510] sm:$0xff]   ;;  %v4054_v15 = vld [vmem:[#allocation5 + $0x548] sm:$0xff]  }
  0xb8   :  { %3734 = vmatpush3.bf16.msra.mxu1 %v4019_v17  ;;  %v243_v17 = vrot.slane %v242_v7, 1  ;;  %v286_v24 = vadd.f32 %v285_v16, %v284_v5  ;;  %v4053_v5 = vld [vmem:[#allocation5 + $0x3c8] sm:$0xff]   ;;  %v380_v13 = vld [vmem:[#allocation2 + $0x98] sm:$0xff] }
  0xb9   :  { %3735 = vmatprep.subr.bf16.mxu1 %v4021_v19  ;;  %v340_v19 = vrot.slane %v339_v10, 1  ;;  %v370_v26 = vrot.slane %v369_v18, 1  ;;  %v387_v16 = vunpack.c.l.bf16 %v380_v13 }
  0xba   :  { %3800 = vmatpush3.bf16.msra.mxu0 %v4020_v28  ;;  %v244_v25 = vadd.f32 %v243_v17, %v242_v7  ;;  %v289_v7 = vld [vmem:[#allocation2 + $0x68] sm:$0xff]  ;;  %v388_v17 = vunpack.c.h.bf16 %v380_v13 }
  0xbb   :  { %3801 = vmatprep.subr.bf16.mxu0 %v4022_v33  ;;  %v341_v28 = vadd.f32 %v340_v19, %v339_v10  ;;  %v511_v33 = vsel %vm481_vm0, %v286_v24, %v250_v23  ;;  %v296_v9 = vunpack.c.l.bf16 %v289_v7  ;;  %v297_v10 = vunpack.c.h.bf16 %v289_v7 }
  0xbc   :  { %3736 = vmatpush3.bf16.msra.mxu1 %v4023_v34  ;;  %v371_v34 = vadd.f32 %v370_v26, %v369_v18  ;;  %v577_v36 = vpack.c.bf16 %v511_v33, %v511_v33  ;;  %v510_v38 = vsel %vm481_vm0, %v280_v30, %v244_v25  ;;  %v4056_v25 = vld [vmem:[#allocation5 + $0x508] sm:$0xff]   ;;  %v4057_v26 = vld [vmem:[#allocation5 + $0x3c0] sm:$0xff]  }
  0xbd   :  { %3737 = vmatprep.subr.bf16.mxu1 %v4025_v35  ;;  %v4032_v35 = vld [vmem:[#allocation5 + $0x538] sm:$0xff]   ;;  %v535_v37 = vsel %vm481_vm0, %v377_v29, %v341_v28  ;;  %v576_v42 = vpack.c.bf16 %v510_v38, %v510_v38  ;;  %v324_v21 = vrot.slane %v297_v10, 4  ;;  %v318_v23 = vrot.slane %v296_v9, 4 }
  0xbe   :  { %3802 = vmatpush3.bf16.msra.mxu0 %v4024_v48  ;;  %v583_v40 = vpack.c.bf16 %v535_v37, %v535_v37  ;;  %v534_v43 = vsel %vm481_vm0, %v371_v34, %v335_v31  ;;  %2358 = vmatprep.mubr.bf16.mxu1 %v577_v36  ;;  %v4037_v48 = vld [vmem:[#allocation5 + $0x3e8] sm:$0xff]   ;;  %v409_v29 = vrot.slane %v387_v16, 4  ;;  %v4058_v31 = vld [vmem:[#allocation5 + $0x540] sm:$0xff]  }
  0xbf   :  { %3803 = vmatprep.subr.bf16.mxu0 %v4026_v54  ;;  %v582_v45 = vpack.c.bf16 %v534_v43, %v534_v43  ;;  %v4042_v54 = vld [vmem:[#allocation5 + $0x560] sm:$0xff]   ;;  %v319_v34 = vadd.f32 %v318_v23, %v296_v9  ;;  %v4065_v23 = vld [vmem:[#allocation5 + $0x4b8] sm:$0xff]  }
  0xc0   :  { %3738 = vmatpush3.bf16.msra.mxu1 %v4027_v58  ;;  %2478 = vmatprep.mubr.bf16.mxu0 %v583_v40  ;;  %v4043_v58 = vld [vmem:[#allocation5 + $0x3a0] sm:$0xff]  }
  0xc1   :  { %3767 = vmatprep.subr.bf16.mxu1 %v4029_v8  ;;  %v292_v8 = vld [vmem:[#allocation2 + $0x80] sm:$0xff] }
  0xc2   :  { %3804 = vmatpush3.bf16.msra.mxu0 %v4028_v14  ;;  %v302_v11 = vunpack.c.l.bf16 %v292_v8  ;;  %v303_v12 = vunpack.c.h.bf16 %v292_v8  ;;  %v383_v14 = vld [vmem:[#allocation2 + $0xb0] sm:$0xff]  ;;  %v4060_v40 = vld [vmem:[#allocation5 + $0x500] sm:$0xff]  }
  0xc3   :  { %3833 = vmatprep.subr.bf16.mxu0 %v4030_v27  ;;  %2359 = vmatmul.mubr.bf16.vlgmr.msra.gmra.mxu1 %v576_v42  ;;  %v393_v18 = vunpack.c.l.bf16 %v383_v14  ;;  %v394_v19 = vunpack.c.h.bf16 %v383_v14  ;;  %v415_v27 = vrot.slane %v388_v17, 4 }
  0xc4   :  { %3768 = vmatpush3.bf16.msra.mxu1 %v4031_v32  ;;  %v360_v22 = vrot.slane %v303_v12, 4  ;;  %v354_v24 = vrot.slane %v302_v11, 4  ;;  %v325_v32 = vadd.f32 %v324_v21, %v297_v10 }
  0xc5   :  { %2479 = vmatmul.mubr.bf16.vlgmr.msra.gmra.mxu0 %v582_v45  ;;  %3769 = vmatprep.subr.bf16.mxu1 %v4033_v39  ;;  %v451_v28 = vrot.slane %v394_v19, 4  ;;  %v445_v30 = vrot.slane %v393_v18, 4  ;;  %v416_v36 = vadd.f32 %v415_v27, %v388_v17  ;;  %v410_v39 = vadd.f32 %v409_v29, %v387_v16  ;;  %v4062_v27 = vld [vmem:[#allocation10 + $0x150] ss:$24 sps:$4 sm:$0xff]  }
  0xc6   :  { %3834 = vmatpush3.bf16.msra.mxu0 %v4032_v35  ;;  %v361_v33 = vadd.f32 %v360_v22, %v303_v12  ;;  %v4059_v35 = vld [vmem:[#allocation5 + $0x380] sm:$0xff]   ;;  %v355_v38 = vadd.f32 %v354_v24, %v302_v11  ;;  %v326_v42 = vrot.slane %v325_v32, 2 }
  0xc7   :  { %3835 = vmatprep.subr.bf16.mxu0 %v4034_v44  ;;  %v452_v37 = vadd.f32 %v451_v28, %v394_v19  ;;  %v320_v44 = vrot.slane %v319_v34, 2  ;;  %v446_v45 = vadd.f32 %v445_v30, %v393_v18  ;;  %v4066_v28 = vld [vmem:[#allocation5 + $0x4f0] sm:$0xff]  }
  0xc8   :  { %3770 = vmatpush3.bf16.msra.mxu1 %v4035_v46  ;;  %v362_v43 = vrot.slane %v361_v33, 2  ;;  %v417_v46 = vrot.slane %v416_v36, 2  ;;  %v4071_v30 = vld [vmem:[#allocation10 + $0x124] ss:$24 sps:$4 sm:$0xff]  }
  0xc9   :  { %3771 = vmatprep.subr.bf16.mxu1 %v4037_v48  ;;  %v356_v48 = vrot.slane %v355_v38, 2 }
  0xca   :  { %3836 = vmatpush3.bf16.msra.mxu0 %v4036_v47  ;;  %v453_v47 = vrot.slane %v452_v37, 2 }
  0xcb   :  { %3837 = vmatprep.subr.bf16.mxu0 %v4038_v50  ;;  %v411_v50 = vrot.slane %v410_v39, 2 }
  0xcc   :  { %3772 = vmatpush3.bf16.msra.mxu1 %v4039_v51  ;;  %v327_v51 = vadd.f32 %v326_v42, %v325_v32  ;;  %v4068_v32 = vld [vmem:[#allocation5 + $0x4e8] sm:$0xff]  }
  0xcd   :  { %3773 = vmatprep.subr.bf16.mxu1 %v4041_v53  ;;  %v321_v53 = vadd.f32 %v320_v44, %v319_v34  ;;  %v4072_v34 = vld [vmem:[#allocation5 + $0x4a8] sm:$0xff]   ;;  %v4074_v44 = vld [vmem:[#allocation5 + $0x4a0] sm:$0xff]  }
  0xce   :  { %3838 = vmatpush3.bf16.msra.mxu0 %v4040_v52  ;;  %v363_v52 = vadd.f32 %v362_v43, %v361_v33  ;;  %v4069_v33 = vld [vmem:[#allocation10 + $0x120] ss:$24 sps:$4 sm:$0xff]  }
  0xcf   :  { %3839 = vmatprep.subr.bf16.mxu0 %v4042_v54  ;;  %v4061_v54 = vld [vmem:[#allocation5 + $0x4f8] sm:$0xff]  }
  0xd0   :  { %3774 = vmatpush3.bf16.msra.mxu1 %v4043_v58  ;;  %v447_v58 = vrot.slane %v446_v45, 2 }
  0xd1   :  { %3775 = vmatprep.subr.bf16.mxu1 %v4045_v60  ;;  %v454_v60 = vadd.f32 %v453_v47, %v452_v37  ;;  %v379_v37 = vld [vmem:[#allocation2 + $0x90] sm:$0xff] }
  0xd2   :  { %3840 = vmatpush3.bf16.msra.mxu0 %v4044_v59  ;;  %v418_v59 = vadd.f32 %v417_v46, %v416_v36  ;;  %v4078_v36 = vld [vmem:[#allocation10 + $0xf4] ss:$24 sps:$4 sm:$0xff]  }
  0xd3   :  { %3841 = vmatprep.subr.bf16.mxu0 %v4046_v61  ;;  %v357_v61 = vadd.f32 %v356_v48, %v355_v38  ;;  %v455_v7 = vrot.slane %v454_v60, 1  ;;  %v382_v38 = vld [vmem:[#allocation2 + $0xa8] sm:$0xff] }
  0xd4   :  { %3776 = vmatpush3.bf16.msra.mxu1 %v4047_v62  ;;  %v412_v62 = vadd.f32 %v411_v50, %v410_v39  ;;  %v385_v39 = vunpack.c.l.bf16 %v379_v37  ;;  %v391_v42 = vunpack.c.l.bf16 %v382_v38  ;;  %v392_v43 = vunpack.c.h.bf16 %v382_v38  ;;  %v4099_v38 = vld [vmem:[#allocation10 + $0x64] ss:$24 sps:$4 sm:$0xff]  }
  0xd5   :  { %3777 = vmatprep.subr.bf16.mxu1 %v4049_v0  ;;  %v328_v0 = vrot.slane %v327_v51, 1  ;;  %v358_v8 = vrot.slane %v357_v61, 1 }
  0xd6   :  { %3842 = vmatpush3.bf16.msra.mxu0 %v4048_v63  ;;  %v4064_v63 = vld [vmem:[#allocation10 + $0x154] ss:$24 sps:$4 sm:$0xff]   ;;  %v413_v9 = vrot.slane %v412_v62, 1  ;;  %v439_v47 = vrot.slane %v392_v43, 4  ;;  %v397_v48 = vrot.slane %v385_v39, 4  ;;  %v433_v50 = vrot.slane %v391_v42, 4 }
  0xd7   :  { %3843 = vmatprep.subr.bf16.mxu0 %v4050_v1  ;;  %v364_v1 = vrot.slane %v363_v52, 1  ;;  %v329_v10 = vadd.f32 %v328_v0, %v327_v51  ;;  %v359_v16 = vadd.f32 %v358_v8, %v357_v61  ;;  %v4076_v51 = vld [vmem:[#allocation10 + $0xf0] ss:$24 sps:$4 sm:$0xff]  }
  0xd8   :  { %3778 = vmatpush3.bf16.msra.mxu1 %v4051_v2  ;;  %v322_v2 = vrot.slane %v321_v53, 1  ;;  %v414_v17 = vadd.f32 %v413_v9, %v412_v62  ;;  %v4081_v8 = vld [vmem:[#allocation5 + $0x490] sm:$0xff]  }
  0xd9   :  { %3779 = vmatprep.subr.bf16.mxu1 %v4053_v5  ;;  %v419_v5 = vrot.slane %v418_v59, 1  ;;  %v365_v11 = vadd.f32 %v364_v1, %v363_v52  ;;  %v4079_v52 = vld [vmem:[#allocation5 + $0x498] sm:$0xff]   ;;  %v4085_v1 = vld [vmem:[#allocation10 + $0xc4] ss:$24 sps:$4 sm:$0xff]  }
  0xda   :  { %3844 = vmatpush3.bf16.msra.mxu0 %v4052_v3  ;;  %v448_v3 = vadd.f32 %v447_v58, %v446_v45  ;;  %v323_v12 = vadd.f32 %v322_v2, %v321_v53  ;;  %v4075_v45 = vld [vmem:[#allocation5 + $0x4d8] sm:$0xff]   ;;  %v398_v58 = vadd.f32 %v397_v48, %v385_v39  ;;  %v4095_v48 = vld [vmem:[#allocation5 + $0x5b0] sm:$0xff]  }
  0xdb   :  { %3845 = vmatprep.subr.bf16.mxu0 %v4054_v15  ;;  %v420_v14 = vadd.f32 %v419_v5, %v418_v59  ;;  %v456_v15 = vadd.f32 %v455_v7, %v454_v60  ;;  %v533_v18 = vsel %vm481_vm0, %v365_v11, %v329_v10  ;;  %v434_v59 = vadd.f32 %v433_v50, %v391_v42  ;;  %v4080_v60 = vld [vmem:[#allocation5 + $0x4d0] sm:$0xff]   ;;  %v4082_v10 = vld [vmem:[#allocation5 + $0x4c8] sm:$0xff]   ;;  %v384_v42 = vld [vmem:[#allocation2 + $0xb8] sm:$0xff] }
  0xdc   :  { %3780 = vmatpush3.bf16.msra.mxu1 %v4055_v20  ;;  %v449_v13 = vrot.slane %v448_v3, 1  ;;  %v581_v20 = vpack.c.bf16 %v533_v18, %v533_v18  ;;  %v532_v22 = vsel %vm481_vm0, %v359_v16, %v323_v12  ;;  %v4086_v18 = vld [vmem:[#allocation5 + $0x488] sm:$0xff]  }
  0xdd   :  { %3781 = vmatprep.subr.bf16.mxu1 %v4057_v26  ;;  %v557_v21 = vsel %vm481_vm0, %v456_v15, %v420_v14  ;;  %v435_v0 = vrot.slane %v434_v59, 2  ;;  %v4096_v50 = vld [vmem:[#allocation5 + $0x5e8] sm:$0xff]  }
  0xde   :  { %3846 = vmatpush3.bf16.msra.mxu0 %v4056_v25  ;;  %v450_v19 = vadd.f32 %v449_v13, %v448_v3  ;;  %v587_v24 = vpack.c.bf16 %v557_v21, %v557_v21  ;;  %v580_v25 = vpack.c.bf16 %v532_v22, %v532_v22  ;;  %2438 = vmatprep.mubr.bf16.mxu1 %v581_v20  ;;  %v4083_v21 = vld [vmem:[#allocation10 + $0xc0] ss:$24 sps:$4 sm:$0xff]  }
  0xdf   :  { %3847 = vmatprep.subr.bf16.mxu0 %v4058_v31  ;;  %v4067_v31 = vld [vmem:[#allocation5 + $0x4b0] sm:$0xff]   ;;  %v436_v7 = vadd.f32 %v435_v0, %v434_v59  ;;  %v4087_v22 = vld [vmem:[#allocation5 + $0x4c0] sm:$0xff]  }
  0xe0   :  { %3782 = vmatpush3.bf16.msra.mxu1 %v4059_v35  ;;  %v556_v26 = vsel %vm481_vm0, %v450_v19, %v414_v17  ;;  %2558 = vmatprep.mubr.bf16.mxu0 %v587_v24  ;;  %v4073_v35 = vld [vmem:[#allocation5 + $0x4e0] sm:$0xff]  }
  0xe1   :  { %3811 = vmatprep.subr.bf16.mxu1 %v4061_v54  ;;  %v586_v29 = vpack.c.bf16 %v556_v26, %v556_v26  ;;  %v440_v54 = vadd.f32 %v439_v47, %v392_v43  ;;  %v437_v15 = vrot.slane %v436_v7, 1 }
  0xe2   :  { %3848 = vmatpush3.bf16.msra.mxu0 %v4060_v40  ;;  %v386_v40 = vunpack.c.h.bf16 %v379_v37  ;;  %v4094_v37 = vld [vmem:[#allocation5 + $0x5f0] sm:$0xff]  }
  0xe3   :  { %3144 = vmatprep.subr.bf16.mxu0 %v4064_v63  ;;  %2439 = vmatmul.mubr.bf16.vlgmr.msra.gmra.mxu1 %v580_v25  ;;  %v441_v62 = vrot.slane %v440_v54, 2  ;;  %v399_v63 = vrot.slane %v398_v58, 2  ;;  %v438_v20 = vadd.f32 %v437_v15, %v436_v7  ;;  %v4333_v25 = vmov 269488144   ;;  %v4106_v7 = vld [vmem:[#allocation10 + $0x34] ss:$24 sps:$4 sm:$0xff]  }
  0xe4   :  { %3812 = vmatpush3.bf16.msra.mxu1 %v4065_v23  ;;  %v403_v46 = vrot.slane %v386_v40, 4  ;;  %v2791_v26 = vunpack.c.l.s4 %v4333_v25 }
  0xe5   :  { %2559 = vmatmul.mubr.bf16.vlgmr.msra.gmra.mxu0 %v586_v29  ;;  %3813 = vmatprep.subr.bf16.mxu1 %v4066_v28  ;;  %v442_v3 = vadd.f32 %v441_v62, %v440_v54  ;;  %v400_v5 = vadd.f32 %v399_v63, %v398_v58  ;;  %v4092_v29 = vld [vmem:[#allocation10 + $0x94] ss:$24 sps:$4 sm:$0xff]  }
  0xe6   :  { %3145 = vmatpush1.bf16.xpose.msra.mxu0 %v4062_v27  ;;  %v404_v53 = vadd.f32 %v403_v46, %v386_v40  ;;  %v381_v40 = vld [vmem:[#allocation2 + $0xa0] sm:$0xff]  ;;  %v396_v46 = vunpack.c.h.bf16 %v384_v42 }
  0xe7   :  { %3146 = vmatprep.subr.bf16.mxu0 %v4071_v30  ;;  %v443_v13 = vrot.slane %v442_v3, 1  ;;  %v401_v14 = vrot.slane %v400_v5, 1  ;;  %v4088_v30 = vld [vmem:[#allocation5 + $0x480] sm:$0xff]   ;;  %v389_v43 = vunpack.c.l.bf16 %v381_v40 }
  0xe8   :  { %3814 = vmatpush3.bf16.msra.mxu1 %v4067_v31  ;;  %v405_v61 = vrot.slane %v404_v53, 2 }
  0xe9   :  { %3815 = vmatprep.subr.bf16.mxu1 %v4068_v32  ;;  %v444_v17 = vadd.f32 %v443_v13, %v442_v3  ;;  %v402_v19 = vadd.f32 %v401_v14, %v400_v5  ;;  %v4089_v32 = vld [vmem:[#allocation5 + $0x5f8] sm:$0xff]   ;;  %v421_v54 = vrot.slane %v389_v43, 4 }
  0xea   :  { %v406_v2 = vadd.f32 %v405_v61, %v404_v53  ;;  %v463_v53 = vrot.slane %v396_v46, 4 }
  0xeb   :  { %v554_v31 = vsel %vm481_vm0, %v438_v20, %v402_v19  ;;  %v422_v62 = vadd.f32 %v421_v54, %v389_v43 }
  0xec   :  { %3816 = vmatpush3.bf16.msra.mxu1 %v4072_v34  ;;  %v407_v12 = vrot.slane %v406_v2, 1  ;;  %v584_v34 = vpack.c.bf16 %v554_v31, %v554_v31  ;;  %v464_v59 = vadd.f32 %v463_v53, %v396_v46 }
  0xed   :  { %3817 = vmatprep.subr.bf16.mxu1 %v4073_v35  ;;  %v4090_v35 = vld [vmem:[#allocation10 + $0x90] ss:$24 sps:$4 sm:$0xff]   ;;  %v423_v14 = vrot.slane %v422_v62, 2 }
  0xee   :  { %3147 = vmatpush1.bf16.xpose.msra.mxu0 %v4069_v33  ;;  %v408_v16 = vadd.f32 %v407_v12, %v406_v2  ;;  %v2792_v33 = vunpack.c.0.s8 %v2791_v26  ;;  %v4101_v2 = vld [vmem:[#allocation5 + $0x5e0] sm:$0xff]   ;;  %v465_v5 = vrot.slane %v464_v59, 2 }
  0xef   :  { %3148 = vmatprep.subr.bf16.mxu0 %v4078_v36  ;;  %v4093_v36 = vld [vmem:[#allocation5 + $0x5b8] sm:$0xff]   ;;  %v424_v25 = vadd.f32 %v423_v14, %v422_v62  ;;  %v4131_v14 = vld [vmem:[#allocation10 + $0xfc] ss:$24 sps:$4 sm:$0xff]  }
  0xf0   :  { %3818 = vmatpush3.bf16.msra.mxu1 %v4074_v44  ;;  %v555_v24 = vsel %vm481_vm0, %v444_v17, %v408_v16  ;;  %v2795_v39 = vsub.s32 %v2792_v33, %v4408_v49  ;;  %v390_v44 = vunpack.c.h.bf16 %v381_v40 }
  0xf1   :  { %3819 = vmatprep.subr.bf16.mxu1 %v4075_v45  ;;  %v585_v28 = vpack.c.bf16 %v555_v24, %v555_v24  ;;  %v395_v45 = vunpack.c.l.bf16 %v384_v42 }
  0xf3   :  { %2518 = vmatprep.mubr.bf16.mxu1 %v585_v28  ;;  %v457_v58 = vrot.slane %v395_v45, 4 }
  0xf4   :  { %3820 = vmatpush3.bf16.msra.mxu1 %v4079_v52  ;;  %v427_v52 = vrot.slane %v390_v44, 4 }
  0xf5   :  { %3821 = vmatprep.subr.bf16.mxu1 %v4080_v60  ;;  %v4100_v60 = vld [vmem:[#allocation5 + $0x5a8] sm:$0xff]   ;;  %v458_v63 = vadd.f32 %v457_v58, %v395_v45  ;;  %v4115_v58 = vld [vmem:[#allocation5 + $0x5c0] sm:$0xff]  }
  0xf6   :  { %3149 = vmatpush1.bf16.xpose.msra.mxu0 %v4076_v51  ;;  %v428_v49 = vadd.f32 %v427_v52, %v390_v44 }
  0xf7   :  { %3150 = vmatprep.subr.bf16.mxu0 %v4085_v1  ;;  %v4097_v1 = vld [vmem:[#allocation10 + $0x60] ss:$24 sps:$4 sm:$0xff]   ;;  %v459_v15 = vrot.slane %v458_v63, 2 }
  0xf8   :  { %3822 = vmatpush3.bf16.msra.mxu1 %v4081_v8  ;;  %v429_v3 = vrot.slane %v428_v49, 2 }
  0xf9   :  { %3823 = vmatprep.subr.bf16.mxu1 %v4082_v10  ;;  %v460_v26 = vadd.f32 %v459_v15, %v458_v63  ;;  %v4134_v15 = vld [vmem:[#allocation10 + $0x104] ss:$24 sps:$4 sm:$0xff]  }
  0xfa   :  { %v430_v10 = vadd.f32 %v429_v3, %v428_v49  ;;  %v4117_v3 = vld [vmem:[#allocation10 + $0x158] ss:$24 sps:$4 sm:$0xff]  }
  0xfc   :  { %3824 = vmatpush3.bf16.msra.mxu1 %v4086_v18  ;;  %v431_v16 = vrot.slane %v430_v10, 1 }
  0xfd   :  { %v2736_v9 = vpop.xlane.xlu0 %2735  ;;  %3825 = vmatprep.subr.bf16.mxu1 %v4087_v22  ;;  %v4104_v22 = vld [vmem:[#allocation10 + $0x30] ss:$24 sps:$4 sm:$0xff]  }
  0xfe   :  { %v2737_v11 = vmax.f32 %v2736_v9, 1e-16  ;;  %3151 = vmatpush1.bf16.xpose.msra.mxu0 %v4083_v21  ;;  %v4102_v9 = vld [vmem:[#allocation5 + $0x5a0] sm:$0xff]   ;;  %v432_v19 = vadd.f32 %v431_v16, %v430_v10  ;;  %v4125_v10 = vld [vmem:[#allocation10 + $0x12c] ss:$24 sps:$4 sm:$0xff]  }
  0xff   :  { %3152 = vmatprep.subr.bf16.mxu0 %v4092_v29  ;;  %v4113_v29 = vld [vmem:[#allocation10 + $0x4] ss:$24 sps:$4 sm:$0xff]   ;;  %v4132_v16 = vld [vmem:[#allocation10 + $0x100] ss:$24 sps:$4 sm:$0xff]  }
 0x100   :  { %4165 = vrsqrt.f32 %v2737_v11  ;;  %3826 = vmatpush3.bf16.msra.mxu1 %v4088_v30  ;;  %v466_v11 = vadd.f32 %v465_v5, %v464_v59 }
 0x101   :  { %v2786_v23 = vpop.xlane.xlu0 %2785  ;;  %3855 = vmatprep.subr.bf16.mxu1 %v4089_v32 }
 0x102   :  { %v2787_v27 = vmax.f32 %v2786_v23, 1e-16  ;;  %v467_v17 = vrot.slane %v466_v11, 1  ;;  %v4107_v23 = vld [vmem:[#allocation5 + $0x598] sm:$0xff]  }
 0x103   :  { %2519 = vmatmul.mubr.bf16.vlgmr.msra.gmra.mxu1 %v584_v34 }
 0x104   :  { %4167 = vrsqrt.f32 %v2787_v27  ;;  %3856 = vmatpush3.bf16.msra.mxu1 %v4093_v36  ;;  %v468_v20 = vadd.f32 %v467_v17, %v466_v11  ;;  %v4108_v27 = vld [vmem:[#allocation5 + $0x5d0] sm:$0xff]   ;;  %v425_v36 = vrot.slane %v424_v25, 1 }
 0x105   :  { %3857 = vmatprep.subr.bf16.mxu1 %v4094_v37  ;;  %v461_v37 = vrot.slane %v460_v26, 1  ;;  %v4137_v17 = vld [vmem:[#allocation10 + $0xcc] ss:$24 sps:$4 sm:$0xff]  }
 0x106   :  { %3153 = vmatpush1.bf16.xpose.msra.mxu0 %v4090_v35  ;;  %v559_v28 = vsel %vm481_vm0, %v468_v20, %v432_v19  ;;  %v4135_v19 = vld [vmem:[#allocation10 + $0xc8] ss:$24 sps:$4 sm:$0xff]  }
 0x107   :  { %3154 = vmatprep.subr.bf16.mxu0 %v4099_v38  ;;  %v589_v31 = vpack.c.bf16 %v559_v28, %v559_v28  ;;  %v462_v52 = vadd.f32 %v461_v37, %v460_v26  ;;  %v4138_v20 = vld [vmem:[#allocation10 + $0xd0] ss:$24 sps:$4 sm:$0xff]  }
 0x108   :  { %3858 = vmatpush3.bf16.msra.mxu1 %v4095_v48  ;;  %v4111_v48 = vld [vmem:[#allocation10] ss:$24 sps:$4 sm:$0xff]  }
 0x109   :  { %3859 = vmatprep.subr.bf16.mxu1 %v4096_v50  ;;  %2598 = vmatprep.mubr.bf16.mxu1 %v589_v31  ;;  %v4114_v50 = vld [vmem:[#allocation5 + $0x588] sm:$0xff]   ;;  %v4141_v28 = vld [vmem:[#allocation10 + $0x98] ss:$24 sps:$4 sm:$0xff]  }
 0x10a   :  { %v4147_v37 = vld [vmem:[#allocation10 + $0x68] ss:$24 sps:$4 sm:$0xff]  }
 0x10c   :  { %3860 = vmatpush3.bf16.msra.mxu1 %v4100_v60  ;;  %v4122_v60 = vld [vmem:[#allocation10 + $0x164] ss:$24 sps:$4 sm:$0xff]  }
 0x10d   :  { %v4166_v47 = vpop.eup %4165  ;;  %3861 = vmatprep.subr.bf16.mxu1 %v4101_v2 }
 0x10e   :  { %v2796_v51 = vrot.slane %v4166_v47, %v2795_v39  ;;  %3155 = vmatpush1.bf16.xpose.msra.mxu0 %v4097_v1 }
 0x10f   :  { %3156 = vmatprep.subr.bf16.mxu0 %v4106_v7  ;;  %v4120_v7 = vld [vmem:[#allocation10 + $0x160] ss:$24 sps:$4 sm:$0xff]  }
 0x110   :  { %v2798_v61 = vmul.f32 %v2796_v51, %v4410_v55  ;;  %v4103_v55 = vld [vmem:[#allocation5 + $0x5d8] sm:$0xff]   ;;  %v2799_v21 = vmul.f32 %v2796_v51, %v4412_v56  ;;  %3862 = vmatpush3.bf16.msra.mxu1 %v4102_v9  ;;  %v4109_v56 = vld [vmem:[#allocation5 + $0x590] sm:$0xff]   ;;  %v426_v51 = vadd.f32 %v425_v36, %v424_v25 }
 0x111   :  { %v4168_v0 = vpop.eup %4167  ;;  %3863 = vmatprep.subr.bf16.mxu1 %v4103_v55  ;;  %v4129_v55 = vld [vmem:[#allocation10 + $0xf8] ss:$24 sps:$4 sm:$0xff]  }
 0x112   :  { %v2809_v8 = vrot.slane %v4168_v0, %v2795_v39  ;;  %v2800_v12 = vmul.f32 0.7, %v2798_v61  ;;  %v2801_v34 = vmul.f32 0.7, %v2799_v21  ;;  %v4116_v61 = vld [vmem:[#allocation5 + $0x580] sm:$0xff]   ;;  %v558_v62 = vsel %vm481_vm0, %v462_v52, %v426_v51 }
 0x113   :  { %v4119_v0 = vld [vmem:[#allocation10 + $0x15c] ss:$24 sps:$4 sm:$0xff]   ;;  %v588_v2 = vpack.c.bf16 %v558_v62, %v558_v62 }
 0x114   :  { %v2811_v13 = vmul.f32 %v2809_v8, %v4423_v4  ;;  %v2812_v4 = vmul.f32 %v2809_v8, %v4425_v6  ;;  %3864 = vmatpush3.bf16.msra.mxu1 %v4107_v23  ;;  %v4110_v6 = vld [vmem:[#allocation5 + $0x5c8] sm:$0xff]  }
 0x115   :  { %3865 = vmatprep.subr.bf16.mxu1 %v4108_v27  ;;  %v4143_v21 = vld [vmem:[#allocation10 + $0x9c] ss:$24 sps:$4 sm:$0xff]  }
 0x116   :  { %v2813_v18 = vmul.f32 0.3, %v2811_v13  ;;  %v2814_v38 = vmul.f32 0.3, %v2812_v4  ;;  %3157 = vmatpush1.bf16.xpose.msra.mxu0 %v4104_v22  ;;  %v4126_v13 = vld [vmem:[#allocation10 + $0x130] ss:$24 sps:$4 sm:$0xff]  }
 0x117   :  { %3158 = vmatprep.subr.bf16.mxu0 %v4113_v29  ;;  %v4146_v23 = vld [vmem:[#allocation10 + $0xa4] ss:$24 sps:$4 sm:$0xff]  }
 0x118   :  { %v2815_v24 = vadd.f32 %v2813_v18, %v2800_v12  ;;  %3866 = vmatpush3.bf16.msra.mxu1 %v4109_v56  ;;  %v2816_v53 = vadd.f32 %v2814_v38, %v2801_v34  ;;  %v4123_v12 = vld [vmem:[#allocation10 + $0x128] ss:$24 sps:$4 sm:$0xff]   ;;  %v4140_v18 = vld [vmem:[#allocation10 + $0xd4] ss:$24 sps:$4 sm:$0xff]  }
 0x119   :  { %3867 = vmatprep.subr.bf16.mxu1 %v4110_v6  ;;  %v4152_v56 = vld [vmem:[#allocation10 + $0x74] ss:$24 sps:$4 sm:$0xff]   ;;  %v4150_v38 = vld [vmem:[#allocation10 + $0x70] ss:$24 sps:$4 sm:$0xff]   ;;  %v4158_v6 = vld [vmem:[#allocation10 + $0x44] ss:$24 sps:$4 sm:$0xff]  }
 0x11a   :  { %v2826_v30 = vrot.slane %v2815_v24, %v4415_v57  ;;  %v2819_v40 = vcombine.high %v2815_v24, %v2815_v24  ;;  %v4485_v63 = vrot.slane %v2816_v53, %v4415_v57 }
 0x11c   :  { %v2834_v35 = vcombine.high %v2826_v30, %v2826_v30  ;;  %v4481_v49 = vrot.slane %v2819_v40, %v4415_v57  ;;  %3868 = vmatpush3.bf16.msra.mxu1 %v4114_v50  ;;  %v2843_v5 = vcombine.high %v4485_v63, %v4485_v63  ;;  %v2850_v9 = vpack.c.bf16 %v2826_v30, %v2826_v30  ;;  %v4128_v57 = vld [vmem:[#allocation10 + $0x134] ss:$24 sps:$4 sm:$0xff]   ;;  %v4144_v30 = vld [vmem:[#allocation10 + $0xa0] ss:$24 sps:$4 sm:$0xff]  }
 0x11d   :  { %3869 = vmatprep.subr.bf16.mxu1 %v4115_v58  ;;  %v4153_v40 = vld [vmem:[#allocation10 + $0x38] ss:$24 sps:$4 sm:$0xff]  }
 0x11e   :  { %v2851_v44 = vpack.c.bf16 %v2834_v35, %v2834_v35  ;;  %3159 = vmatpush1.bf16.xpose.msra.mxu0 %v4111_v48  ;;  %v2835_v1 = vcombine.high %v4481_v49, %v4481_v49  ;;  %v2855_v11 = vpack.c.bf16 %v2843_v5, %v2843_v5 }
 0x11f   :  { %3224 = vmatprep.subr.bf16.mxu0 %v4122_v60  ;;  %v2854_v60 = vpack.c.bf16 %v4485_v63, %v4485_v63 }
 0x120   :  { %3176 = vmatprep.mubr.bf16.mxu0 %v2851_v44  ;;  %3870 = vmatpush3.bf16.msra.mxu1 %v4116_v61  ;;  %v2853_v8 = vpack.c.bf16 %v2835_v1, %v2835_v1  ;;  %v4164_v44 = vld [vmem:[#allocation10 + $0x14] ss:$24 sps:$4 sm:$0xff]  }
 0x121   :  { %v3629_v32 = vpop.f32.mrf.mxu1  ;;  %v3673_v33 = vpop.f32.mrf.mxu0  ;;  %3184 = vmatprep.subr.bf16.mxu1 %v4119_v0 }
 0x123   :  { %v3630_v39 = vpop.f32.mrf.mxu1  ;;  %v3674_v43 = vpop.f32.mrf.mxu0  ;;  %2599 = vmatmul.mubr.bf16.vlgmr.msra.gmra.mxu1 %v588_v2 }
 0x124   :  { %v4476_v42 = vadd.f32 %v3630_v39, %v3629_v32  ;;  %v4478_v45 = vadd.f32 %v3674_v43, %v3673_v33  ;;  %3185 = vmatpush1.bf16.xpose.msra.mxu1 %v4117_v3  ;;  %3216 = vmatprep.mubr.bf16.mxu1 %v2853_v8  ;;  %v4149_v32 = vld [vmem:[#allocation10 + $0x6c] ss:$24 sps:$4 sm:$0xff]   ;;  %v4155_v39 = vld [vmem:[#allocation10 + $0x3c] ss:$24 sps:$4 sm:$0xff]  }
 0x125   :  { %v3632_v46 = vpop.f32.mrf.mxu1  ;;  %v3676_v47 = vpop.f32.mrf.mxu0  ;;  %3177 = vmatmul.mubr.bf16.vlgmr.msra.gmra.mxu0 %v2850_v9  ;;  %3186 = vmatprep.subr.bf16.mxu1 %v4125_v10  ;;  %v4161_v43 = vld [vmem:[#allocation10 + $0xc] ss:$24 sps:$4 sm:$0xff]  }
 0x126   :  { %3225 = vmatpush1.bf16.xpose.msra.mxu0 %v4120_v7  ;;  %3256 = vmatprep.mubr.bf16.mxu0 %v2855_v11  ;;  %v4162_v46 = vld [vmem:[#allocation10 + $0x10] ss:$24 sps:$4 sm:$0xff]  }
 0x127   :  { %v3633_v54 = vpop.f32.mrf.mxu1  ;;  %v3677_v59 = vpop.f32.mrf.mxu0  ;;  %3226 = vmatprep.subr.bf16.mxu0 %v4128_v57 }
 0x128   :  { %v2852_v54 = vpack.c.bf16 %v4481_v49, %v4481_v49 }
 0x12c   :  { %3187 = vmatpush1.bf16.xpose.msra.mxu1 %v4123_v12 }
 0x12d   :  { %3188 = vmatprep.subr.bf16.mxu1 %v4131_v14 }
 0x12e   :  { %3227 = vmatpush1.bf16.xpose.msra.mxu0 %v4126_v13 }
 0x12f   :  { %3228 = vmatprep.subr.bf16.mxu0 %v4134_v15 }
 0x134   :  { %3189 = vmatpush1.bf16.xpose.msra.mxu1 %v4129_v55 }
 0x135   :  { %3190 = vmatprep.subr.bf16.mxu1 %v4137_v17 }
 0x136   :  { %3229 = vmatpush1.bf16.xpose.msra.mxu0 %v4132_v16 }
 0x137   :  { %3230 = vmatprep.subr.bf16.mxu0 %v4140_v18 }
 0x13c   :  { %3191 = vmatpush1.bf16.xpose.msra.mxu1 %v4135_v19 }
 0x13d   :  { %3192 = vmatprep.subr.bf16.mxu1 %v4143_v21 }
 0x13e   :  { %3231 = vmatpush1.bf16.xpose.msra.mxu0 %v4138_v20 }
 0x13f   :  { %3232 = vmatprep.subr.bf16.mxu0 %v4146_v23 }
 0x143   :  { %v3651_v22 = vpop.f32.mrf.mxu1 }
 0x144   :  { %3193 = vmatpush1.bf16.xpose.msra.mxu1 %v4141_v28 }
 0x145   :  { %v3652_v24 = vpop.f32.mrf.mxu1  ;;  %v3717_v4 = vpop.f32.mrf.mxu0  ;;  %3194 = vmatprep.subr.bf16.mxu1 %v4149_v32 }
 0x146   :  { %v3653_v25 = vadd.f32 %v3652_v24, %v3651_v22  ;;  %3233 = vmatpush1.bf16.xpose.msra.mxu0 %v4144_v30 }
 0x147   :  { %v3654_v26 = vpop.f32.mrf.mxu1  ;;  %v3718_v31 = vpop.f32.mrf.mxu0  ;;  %3234 = vmatprep.subr.bf16.mxu0 %v4152_v56  ;;  %v4498_v56 = vand.u32 127, %v97_v41 }
 0x148   :  { %v2201_v27 = vadd.f32 %v3653_v25, %v4476_v42  ;;  %v3719_v34 = vadd.f32 %v3718_v31, %v3717_v4  ;;  %v4156_v42 = vld [vmem:[#allocation10 + $0x40] ss:$24 sps:$4 sm:$0xff]  }
 0x149   :  { %v3655_v29 = vpop.f32.mrf.mxu1  ;;  %v3720_v35 = vpop.f32.mrf.mxu0  ;;  %vm99_vm2 = vcmp.lt.s32.totalorder %v4498_v56, 32  ;;  %vm3319_vm9 = vcmp.eq.s32.totalorder %v4498_v56, 0  ;;  %vm3322_vm12 = vcmp.eq.s32.totalorder %v4498_v56, 1 }
 0x14a   :  { %v2241_v33 = vadd.f32 %v4478_v45, %v2201_v27  ;;  %v4159_v45 = vld [vmem:[#allocation10 + $0x8] ss:$24 sps:$4 sm:$0xff]  }
 0x14b   :  { %v3721_v36 = vpop.f32.mrf.mxu0 }
 0x14c   :  { %3195 = vmatpush1.bf16.xpose.msra.mxu1 %v4147_v37 }
 0x14d   :  { %3196 = vmatprep.subr.bf16.mxu1 %v4155_v39 }
 0x14e   :  { %3235 = vmatpush1.bf16.xpose.msra.mxu0 %v4150_v38  ;;  %v3562_v38 = vld [vmem:[%s4556_s2] ss:$0 sm:$0xff] }
 0x14f   :  { %3236 = vmatprep.subr.bf16.mxu0 %v4158_v6 }
 0x154   :  { %3197 = vmatpush1.bf16.xpose.msra.mxu1 %v4153_v40 }
 0x155   :  { %3198 = vmatprep.subr.bf16.mxu1 %v4161_v43 }
 0x156   :  { %3237 = vmatpush1.bf16.xpose.msra.mxu0 %v4156_v42 }
 0x157   :  { %3238 = vmatprep.subr.bf16.mxu0 %v4164_v44  ;;  %v4334_v44 = vmov 0  }
 0x158   :  { %3900 = vset.pattern.permute.xlu0 %v4334_v44 }
 0x15c   :  { %3199 = vmatpush1.bf16.xpose.msra.mxu1 %v4159_v45 }
 0x15e   :  { %3239 = vmatpush1.bf16.xpose.msra.mxu0 %v4162_v46 }
 0x163   :  { %v3695_v47 = vpop.f32.mrf.mxu1  ;;  %3217 = vmatmul.mubr.bf16.vlgmr.msra.gmra.mxu1 %v2852_v54 }
 0x165   :  { %v3696_v48 = vpop.f32.mrf.mxu1  ;;  %v3761_v51 = vpop.f32.mrf.mxu0  ;;  %3257 = vmatmul.mubr.bf16.vlgmr.msra.gmra.mxu0 %v2854_v60 }
 0x166   :  { %v3697_v50 = vadd.f32 %v3696_v48, %v3695_v47 }
 0x167   :  { %v3698_v52 = vpop.f32.mrf.mxu1  ;;  %v3762_v58 = vpop.f32.mrf.mxu0 }
 0x168   :  { %v2281_v53 = vadd.f32 %v3697_v50, %v2241_v33  ;;  %v3763_v61 = vadd.f32 %v3762_v58, %v3761_v51 }
 0x169   :  { %v3699_v59 = vpop.f32.mrf.mxu1  ;;  %v3764_v0 = vpop.f32.mrf.mxu0 }
 0x16a   :  { %v2321_v62 = vadd.f32 %v3719_v34, %v2281_v53 }
 0x16b   :  { %v3765_v1 = vpop.f32.mrf.mxu0 }
 0x183   :  { %v3739_v2 = vpop.f32.mrf.mxu1 }
 0x185   :  { %v3805_v3 = vpop.f32.mrf.mxu0  ;;  %v3740_v5 = vpop.f32.mrf.mxu1 }
 0x186   :  { %v3741_v7 = vadd.f32 %v3740_v5, %v3739_v2 }
 0x187   :  { %v3806_v8 = vpop.f32.mrf.mxu0  ;;  %v3742_v10 = vpop.f32.mrf.mxu1 }
 0x188   :  { %v3807_v9 = vadd.f32 %v3806_v8, %v3805_v3  ;;  %v2361_v57 = vadd.f32 %v3741_v7, %v2321_v62  ;;  %v4519_v3 = vld [vmem:[%s4560_s6] sm:$0x3]  ;;  %s4336_s6 = smov [#allocation11]  }
 0x189   :  { %v3808_v49 = vpop.f32.mrf.mxu0  ;;  %v3743_v11 = vpop.f32.mrf.mxu1  ;;  %s3340_s15 = sshll.u32 %s4336_s6, 4  ;;  %s3341_s15 = int_to_ptr.vmem [resolvable:$true] %s3340_s15 }
 0x18a   :  { %v2401_v13 = vadd.f32 %v3763_v61, %v2361_v57  ;;  %s4273_s18 = scalar_lea.vmem %s3341_s15, 32  ;;  %p4278_p12 = scmp.lt.s32.totalorder %s3341_s15, %s3341_s15 }
 0x18b   :  { %v3809_v12 = vpop.f32.mrf.mxu0  ;;  %p4274_p11 = scmp.ne.s32.totalorder %s3341_s15, %s4273_s18  ;;  %p4279_p13 = scmp.lt.s32.totalorder %s4273_s18, %s4273_s18 }
 0x18d   :  { %p4280_p0 = por %p4279_p13, %p4278_p12 }
 0x18f   :  { %p4281_p1 = pnand %p4280_p0, %p4274_p11 }
 0x1a3   :  { %v3783_v14 = vpop.f32.mrf.mxu1 }
 0x1a5   :  { %v3849_v63 = vpop.f32.mrf.mxu0  ;;  %v3784_v15 = vpop.f32.mrf.mxu1 }
 0x1a6   :  { %v3785_v55 = vadd.f32 %v3784_v15, %v3783_v14 }
 0x1a7   :  { %v3850_v16 = vpop.f32.mrf.mxu0  ;;  %v3786_v17 = vpop.f32.mrf.mxu1 }
 0x1a8   :  { %v2441_v18 = vadd.f32 %v3785_v55, %v2401_v13  ;;  %v3851_v29 = vadd.f32 %v3850_v16, %v3849_v63  ;;  %v4335_v17 = vmov 0.0  }
 0x1a9   :  { %v3852_v19 = vpop.f32.mrf.mxu0  ;;  %v3787_v20 = vpop.f32.mrf.mxu1 }
 0x1aa   :  { %v2481_v22 = vadd.f32 %v3807_v9, %v2441_v18 }
 0x1ab   :  { %v3853_v21 = vpop.f32.mrf.mxu0 }
 0x1c3   :  { %v3827_v23 = vpop.f32.mrf.mxu1 }
 0x1c5   :  { %v3828_v24 = vpop.f32.mrf.mxu1 }
 0x1c6   :  { %v3829_v4 = vadd.f32 %v3828_v24, %v3827_v23 }
 0x1c7   :  { %v3830_v25 = vpop.f32.mrf.mxu1 }
 0x1c8   :  { %v2521_v27 = vadd.f32 %v3829_v4, %v2481_v22 }
 0x1c9   :  { %v3831_v26 = vpop.f32.mrf.mxu1 }
 0x1ca   :  { %v2561_v32 = vadd.f32 %v3851_v29, %v2521_v27 }
 0x1e3   :  { %v3871_v28 = vpop.f32.mrf.mxu1 }
 0x1e5   :  { %v3178_v30 = vpop.f32.mrf.mxu0  ;;  %v3872_v31 = vpop.f32.mrf.mxu1 }
 0x1e6   :  { %v3873_v33 = vadd.f32 %v3872_v31, %v3871_v28 }
 0x1e7   :  { %v3180_v34 = vpop.f32.mrf.mxu0  ;;  %v3874_v35 = vpop.f32.mrf.mxu1 }
 0x1e8   :  { %v2601_v36 = vadd.f32 %v3873_v33, %v2561_v32 }
 0x1e9   :  { %v3181_v37 = vpop.f32.mrf.mxu0  ;;  %v3875_v39 = vpop.f32.mrf.mxu1 }
 0x1ea   :  { %v2606_v6 = vmul.f32 0.125, %v2601_v36 }
 0x1eb   :  { %v3182_v40 = vpop.f32.mrf.mxu0 }
 0x1ec   :  { %v2614_v42 = vadd.f32 %v3562_v38, %v2606_v6 }
 0x1ee   :  { %2615 = vst [vmem:[#allocation11] sm:$0x3] %v2614_v42  ;;  %v2616_v43 = vsel %vm99_vm2, %v2614_v42, -1e+30 }
 0x1ef   :  { %v2618_v41 = vsel %vm2617_vm1, %v2616_v43, -inf }
 0x1f0   :  { %2619 = vmax.xlane.f32.xlu1 %v2618_v41 }
 0x223   :  { %v3218_v45 = vpop.f32.mrf.mxu1 }
 0x224   :  { %v3219_v46 = vadd.f32 %v3218_v45, %v3178_v30 }
 0x225   :  { %v3258_v47 = vpop.f32.mrf.mxu0  ;;  %v3220_v48 = vpop.f32.mrf.mxu1 }
 0x226   :  { %v4507_v50 = vadd.f32 %v3258_v47, %v3219_v46 }
 0x227   :  { %v3260_v51 = vpop.f32.mrf.mxu0  ;;  %v3221_v52 = vpop.f32.mrf.mxu1 }
 0x228   :  { %3264 = vst [vmem:[#allocation12] sm:$0x3] %v4507_v50  ;;  %v3281_v54 = vsel %vm99_vm2, %v4507_v50, -1e+30 }
 0x229   :  { %v3261_v53 = vpop.f32.mrf.mxu0  ;;  %v3222_v58 = vpop.f32.mrf.mxu1  ;;  %v3282_v59 = vsel %vm2617_vm1, %v3281_v54, -inf }
 0x22a   :  { %3283 = vmax.xlane.f32.xlu1 %v3282_v59 }
 0x22b   :  { %v3262_v60 = vpop.f32.mrf.mxu0 }
 0x279   :  { %v2620_v61 = vpop.xlane.xlu1 %2619 }
 0x27a   :  { %vm2649_vm3 = vcmp.eq.f32.partialorder %v2616_v43, %v2620_v61  ;;  %v2621_v5 = vsub.f32 %v2616_v43, %v2620_v61 }
 0x27b   :  { %v2650_v62 = vsel %vm2649_vm3, %v4498_v56, 128 }
 0x27c   :  { %v2651_v0 = vsel %vm2617_vm1, %v2650_v62, 2147483647  ;;  %v2622_v7 = vmul.f32 1.442695, %v2621_v5 }
 0x27d   :  { %v2653_v1 = vshra.s32 %v2651_v0, 16  ;;  %v2652_v13 = vand.u32 65535, %v2651_v0 }
 0x27e   :  { %4169 = vpow2.f32 %v2622_v7 }
 0x27f   :  { %v2655_v2 = vcvt.s32.f32 %v2653_v1  ;;  %v2654_v63 = vcvt.s32.f32 %v2652_v13 }
 0x281   :  { %2656 = vmin.xlane.f32.xlu0 %v2655_v2 }
 0x28b   :  { %v4170_v11 = vpop.eup %4169 }
 0x28c   :  { %v2624_v12 = vsel %vm2617_vm1, %v4170_v11, 0.0 }
 0x297   :  { %101 = vperm.xlu0 %3900, %v4519_v3  }
 0x2b3   :  { %v3284_v8 = vpop.xlane.xlu1 %3283 }
 0x2b4   :  { %vm3285_vm4 = vcmp.eq.f32.partialorder %v3281_v54, %v3284_v8 }
 0x2b5   :  { %v3286_v9 = vsel %vm3285_vm4, %v4498_v56, 128 }
 0x2b6   :  { %v3287_v10 = vsel %vm2617_vm1, %v3286_v9, 2147483647 }
 0x2b7   :  { %v3289_v57 = vshra.s32 %v3287_v10, 16  ;;  %v3288_v16 = vand.u32 65535, %v3287_v10 }
 0x2b9   :  { %v3291_v49 = vcvt.s32.f32 %v3289_v57  ;;  %v3290_v20 = vcvt.s32.f32 %v3288_v16 }
 0x2bb   :  { %3292 = vmin.xlane.f32.xlu1 %v3291_v49 }
 0x2bf   :  { %2625 = vadd.xlane.f32.xlu1 %v2624_v12 }
 0x30a   :  { %v2657_v14 = vpop.xlane.xlu0 %2656 }
 0x30b   :  { %vm2658_vm5 = vcmp.eq.f32.partialorder %v2655_v2, %v2657_v14  ;;  %v2663_v26 = vcvt.f32.s32 %v2657_v14 }
 0x30c   :  { %v2659_v15 = vsel %vm2658_vm5, %v2654_v63, inf }
 0x30d   :  { %2660 = vmin.xlane.f32.xlu1 %v2659_v15  ;;  %v2664_v27 = vshll.u32 %v2663_v26, 16 }
 0x312   :  { %v102_v55 = vpop.permute.xlu0 %101 }
 0x313   :  { %vm103_vm6 = vcmp.eq.s32.totalorder %v4498_v56, %v102_v55 }
 0x314   :  { %v3369_v18 = vsel %vm103_vm6, 1.0, %v4335_v17 }
 0x315   :  { %v2630_v22 = vmul.f32 %v3369_v18, %v2614_v42  ;;  %v3265_v32 = vsub.f32 %v4507_v50, %v3369_v18 }
 0x317   :  { %v2631_v23 = vsel %vm2617_vm1, %v2630_v22, 0.0  ;;  %v3266_v6 = vsel %vm99_vm2, %v3265_v32, 0.0 }
 0x318   :  { %v3267_v44 = vmul.f32 %v3266_v6, %v3266_v6 }
 0x31a   :  { %v3268_v48 = vsel %vm2617_vm1, %v3267_v44, 0.0 }
 0x344   :  { %v3293_v19 = vpop.xlane.xlu1 %3292 }
 0x345   :  { %vm3294_vm7 = vcmp.eq.f32.partialorder %v3291_v49, %v3293_v19  ;;  %v3299_v30 = vcvt.f32.s32 %v3293_v19 }
 0x346   :  { %v3295_v21 = vsel %vm3294_vm7, %v3290_v20, inf }
 0x347   :  { %3296 = vmin.xlane.f32.xlu1 %v3295_v21  ;;  %v3300_v34 = vshll.u32 %v3299_v30, 16 }
 0x348   :  { %v2626_v24 = vpop.xlane.xlu1 %2625 }
 0x349   :  { %4171 = vlog2.f32 %v2626_v24 }
 0x34b   :  { %2632 = vadd.xlane.f32.xlu1 %v2631_v23 }
 0x356   :  { %v4172_v29 = vpop.eup %4171 }
 0x357   :  { %v2628_v31 = vmul.f32 0.6931472, %v4172_v29 }
 0x359   :  { %v2629_v38 = vadd.f32 %v2628_v31, %v2620_v61 }
 0x396   :  { %v2661_v25 = vpop.xlane.xlu1 %2660 }
 0x397   :  { %v2662_v4 = vcvt.f32.s32 %v2661_v25 }
 0x399   :  { %v2665_v28 = vadd.s32 %v2664_v27, %v2662_v4 }
 0x39b   :  { %vm2666_vm8 = vcmp.lt.s32.totalorder %v2665_v28, 31 }
 0x39c   :  { %v2667_v36 = vsel %vm2666_vm8, %v2665_v28, 31 }
 0x39d   :  { %v3320_v40 = vcvt.s32.f32 %v2667_v36  ;;  %vm2668_vm13 = vcmp.eq.s32.totalorder %v2667_v36, %v4519_v3 }
 0x39e   :  { %v3563_v50 = vsel %vm2668_vm13, 1.0, %v4335_v17 }
 0x39f   :  { %v3321_v46 = vsel %vm3319_vm9, %v3320_v40, 0.0  ;;  %v2671_v51 = vsel %vm2635_vm11, %v3563_v50, 0.0 }
 0x3d0   :  { %v3297_v33 = vpop.xlane.xlu1 %3296 }
 0x3d1   :  { %v3298_v35 = vcvt.f32.s32 %v3297_v33 }
 0x3d3   :  { %v3301_v37 = vadd.s32 %v3300_v34, %v3298_v35 }
 0x3d4   :  { %v2633_v39 = vpop.xlane.xlu1 %2632 }
 0x3d5   :  { %v2634_v42 = vsub.f32 %v2629_v38, %v2633_v39  ;;  %vm3302_vm10 = vcmp.lt.s32.totalorder %v3301_v37, 31 }
 0x3d6   :  { %v3303_v43 = vsel %vm3302_vm10, %v3301_v37, 31 }
 0x3d7   :  { %v2636_v41 = vsel %vm2635_vm11, %v2634_v42, 0.0  ;;  %v3323_v45 = vcvt.s32.f32 %v3303_v43  ;;  %vm3304_vm14 = vcmp.eq.s32.totalorder %v3303_v43, %v4519_v3 }
 0x3d8   :  { %2637 = vadd.xlane.f32.xlu1 %v2636_v41  ;;  %v3612_v52 = vsel %vm3304_vm14, 1.0, %v4335_v17 }
 0x3d9   :  { %v4534_v47 = vsel %vm3322_vm12, %v3323_v45, %v3321_v46  ;;  %v3307_v53 = vsel %vm2635_vm11, %v3612_v52, 0.0 }
 0x3dc   :  { %3269 = vadd.xlane.f32.xlu1 %v3268_v48 }
 0x3e0   :  { %2672 = vadd.xlane.f32.xlu1 %v2671_v51 }
 0x3e4   :  { %3308 = vadd.xlane.f32.xlu1 %v3307_v53 }
 0x3e5   :  { %4284 = shalt.err (!%p4281_p1)
}
 0x3e6   :  { %3343 = dma.vmem_to_hbm [thread:$0]  %s3341_s15, 32, %s4561_s7, [#allocation4]  }
 0x3e7   :  { %s4293_s21 = scalar_lea.vmem %s3351_s17, 32  ;;  %p4298_p3 = scmp.lt.s32.totalorder %s3351_s17, %s3351_s17 }
 0x3e8   :  { %p4294_p2 = scmp.ne.s32.totalorder %s3351_s17, %s4293_s21  ;;  %p4299_p4 = scmp.lt.s32.totalorder %s4293_s21, %s4293_s21 }
 0x3ea   :  { %p4300_p5 = por %p4299_p4, %p4298_p3 }
 0x3ec   :  { %p4301_p6 = pnand %p4300_p5, %p4294_p2 }
 0x3ee   :  { %4304 = shalt.err (!%p4301_p6)
}
 0x3ef   :  { %3353 = dma.vmem_to_hbm [thread:$0]  %s3351_s17, 32, %s4562_s8, [#allocation13]   ;;  %vm3325_vm15 = vcmp.eq.s32.totalorder %v4498_v56, 2  ;;  %vm3327_vm0 = vcmp.eq.s32.totalorder %v4498_v56, 3  ;;  %vm3329_vm1 = vcmp.eq.s32.totalorder %v4498_v56, 4  ;;  %vm3331_vm2 = vcmp.eq.s32.totalorder %v4498_v56, 5 }
 0x461   :  { %v2638_v54 = vpop.xlane.xlu1 %2637 }
 0x462   :  { %v2639_v58 = vrot.slane %v2638_v54, 4 }
 0x464   :  { %v2640_v59 = vadd.f32 %v2639_v58, %v2638_v54 }
 0x465   :  { %v3270_v60 = vpop.xlane.xlu1 %3269 }
 0x466   :  { %v2641_v61 = vrot.slane %v2640_v59, 2  ;;  %v3271_v62 = vrot.slane %v3270_v60, 4 }
 0x468   :  { %v3272_v0 = vadd.f32 %v3271_v62, %v3270_v60  ;;  %v2642_v1 = vadd.f32 %v2641_v61, %v2640_v59 }
 0x469   :  { %v2673_v2 = vpop.xlane.xlu1 %2672 }
 0x46a   :  { %v3273_v3 = vrot.slane %v3272_v0, 2  ;;  %v2674_v5 = vrot.slane %v2673_v2, 4  ;;  %v2643_v7 = vrot.slane %v2642_v1, 1 }
 0x46c   :  { %v2675_v8 = vadd.f32 %v2674_v5, %v2673_v2  ;;  %v2644_v9 = vadd.f32 %v2643_v7, %v2642_v1  ;;  %v3274_v57 = vadd.f32 %v3273_v3, %v3272_v0 }
 0x46d   :  { %v3309_v10 = vpop.xlane.xlu1 %3308 }
 0x46e   :  { %v2676_v49 = vrot.slane %v2675_v8, 2  ;;  %v3310_v11 = vrot.slane %v3309_v10, 4  ;;  %3877 = vpush %v2644_v9  ;;  %v3275_v14 = vrot.slane %v3274_v57, 1 }
 0x470   :  { %v3311_v12 = vadd.f32 %v3310_v11, %v3309_v10  ;;  %v2677_v13 = vadd.f32 %v2676_v49, %v2675_v8  ;;  %v3276_v17 = vadd.f32 %v3275_v14, %v3274_v57 }
 0x472   :  { %v3312_v63 = vrot.slane %v3311_v12, 2  ;;  %v2678_v15 = vrot.slane %v2677_v13, 1 }
 0x474   :  { %v3313_v55 = vadd.f32 %v3312_v63, %v3311_v12  ;;  %v2679_v16 = vadd.f32 %v2678_v15, %v2677_v13 }
 0x476   :  { %3879 = vpush %v2679_v16  ;;  %v3314_v18 = vrot.slane %v3313_v55, 1 }
 0x477   :  { %3881 = vpush %v3276_v17 }
 0x478   :  { %v3315_v19 = vadd.f32 %v3314_v18, %v3313_v55 }
 0x47a   :  { %3883 = vpush %v3315_v19 }
 0x49f   :  { %s3878_s7 = spop %3877 }
 0x4a0   :  { %v2646_v20 = vstv %s3878_s7 }
 0x4a1   :  { %v2648_v21 = vmul.f32 0.5, %v2646_v20 }
 0x4a3   :  { %v3326_v25 = vsel %vm3325_vm15, %v2648_v21, %v4534_v47 }
 0x4a7   :  { %s3880_s8 = spop %3879 }
 0x4a8   :  { %v2681_v22 = vstv %s3880_s8  ;;  %s3882_s1 = spop %3881 }
 0x4a9   :  { %v2682_v23 = vmul.f32 0.5, %v2681_v22  ;;  %v3278_v24 = vstv %s3882_s1 }
 0x4aa   :  { %v3280_v26 = vmul.f32 0.015625, %v3278_v24 }
 0x4ab   :  { %v3328_v4 = vsel %vm3327_vm0, %v2682_v23, %v3326_v25  ;;  %s3884_s24 = spop %3883 }
 0x4ac   :  { %v3317_v27 = vstv %s3884_s24  ;;  %v3330_v29 = vsel %vm3329_vm1, %v3280_v26, %v3328_v4 }
 0x4ad   :  { %v3318_v28 = vmul.f32 0.5, %v3317_v27 }
 0x4af   :  { %v3332_v30 = vsel %vm3331_vm2, %v3318_v28, %v3330_v29 }
 0x4b0   :  { %3333 = vst [vmem:[%s4563_s9] sm:$0x3] %v3332_v30 }
 0x4b1   :  { %4319 = dma.done.wait [#allocation4], 32  }
 0x4b2   :  { %4320 = vsyncadd [#allocation4], 4294967264 }
 0x4b3   :  { %4321 = dma.done.wait [#allocation13], 32  }
 0x4b4   :  { %4322 = vsyncadd [#allocation13], 4294967264 }
 0x4b5   :  { %3364 = vsyncpa [#allocation3], 1 }
 0x4b6   :  { %3365 = vsyncpa [#allocation6], 1 }
 0x4b7   :  { %3366 = vsyncpa [#allocation9], 1 }
 0x4b8   :  { %3367 = vsyncpa [#allocation4], 1 }
 0x4b9   :  { %3368 = vsyncpa [#allocation13], 1 }

</bundles_post_ra>
